<compile_context>
chip_gen: v5e
topology: v5e:2x2
jax: 0.10.0
libtpu: 0.0.40
codegen_flags: <defaults>
</compile_context>

<pallas_src>
import jax
import jax.numpy as jnp
import numpy as np
from jax.experimental import pallas as pl
from jax.experimental.pallas import tpu as pltpu


LANE = 128  # TPU lane width: last-dim quantum for lane-dense stores


def _round_up(n, m):
    return ((n + m - 1) // m) * m


# ---------------------------------------------------------------------------
# Kernel 1: identity-adjacency fast path (the module's actual pipeline).
# Grid axis 0 tiles node rows; every tile is independent ("parallel").
# ---------------------------------------------------------------------------
def pythagoras_identity_kernel(x_ref, w1_ref, wm_ref, bias_ref, cw_ref, cb_ref,
                               h_ref, nlog_ref):
    f32 = jnp.float32
    bias = bias_ref[...]                                  # (2, H) f32: [b1, folded bias]

    # feature_encoder Linear1 + ReLU   (bf16 operands, f32 accumulate/bias)
    t = jnp.dot(x_ref[...], w1_ref[...], preferred_element_type=f32) + bias[0:1, :]
    t = jnp.maximum(t, 0.0)

    # encoder Linear2 + both GCN layers (A_hat == I) pre-folded into one matmul
    h = jnp.dot(t.astype(wm_ref.dtype), wm_ref[...],
                preferred_element_type=f32) + bias[1:2, :]
    h_ref[...] = h

    # per-node classifier logits (pool == I on the module's single-node graphs);
    # logits slab is lane-dense (class dim padded to 128)
    nlog_ref[...] = jnp.dot(h.astype(cw_ref.dtype), cw_ref[...],
                            preferred_element_type=f32) + cb_ref[...]


# ---------------------------------------------------------------------------
# Kernel 2: general dense-adjacency fallback (graphs that do have edges).
# Untiled single invocation; W2 is folded into GCN-1's weight.
# ---------------------------------------------------------------------------
def pythagoras_dense_kernel(x_ref, adj_ref, pool_ref, w1_ref, gw_ref, bias_ref,
                            cw_ref, cb_ref, logits_ref, h_ref):
    f32 = jnp.float32
    bf = w1_ref.dtype
    adj = adj_ref[...]                                    # bf16
    bias = bias_ref[...]                                  # (4, H) f32: [b1, b2@Gw1, gb1, gb2]

    # feature_encoder Linear1 + ReLU
    t = jnp.dot(x_ref[...], w1_ref[...], preferred_element_type=f32) + bias[0:1, :]
    t = jnp.maximum(t, 0.0)

    # GCNConv 1 with encoder Linear2 folded in: A @ (t @ (W2 Gw1) + b2 Gw1) + gb1
    u = jnp.dot(t.astype(bf), gw_ref[0], preferred_element_type=f32) + bias[1:2, :]
    h = jnp.dot(adj, u.astype(bf), preferred_element_type=f32) + bias[2:3, :]
    # GCNConv 2: A @ (h @ Gw2) + gb2
    v = jnp.dot(h.astype(bf), gw_ref[1], preferred_element_type=f32)
    h = jnp.dot(adj, v.astype(bf), preferred_element_type=f32) + bias[3:4, :]
    h_ref[...] = h

    # global_mean_pool + classifier (lane-dense padded logits)
    hg = jnp.dot(pool_ref[...], h.astype(bf), preferred_element_type=f32)
    logits_ref[...] = jnp.dot(hg.astype(cw_ref.dtype), cw_ref[...],
                              preferred_element_type=f32) + cb_ref[...]


# ---------------------------------------------------------------------------
# Host / wrapper glue
# ---------------------------------------------------------------------------
def _pack_classifier(cw, cb, c_pad):
    """Pad classifier weight/bias to a lane-dense class dim; weight -> bf16."""
    h_dim, c = cw.shape
    cw_pad = jnp.zeros((h_dim, c_pad), jnp.float32).at[:, :c].set(cw)
    cb_pad = jnp.zeros((1, c_pad), jnp.float32).at[:, :c].set(cb)
    return cw_pad.astype(jnp.bfloat16), cb_pad            # bias stays f32


@jax.jit
def _forward_identity(x, params):
    """A_hat == I path. Returns (h[n,H] f32, per-node logits[n,C] f32)."""
    n, f = x.shape
    h_dim = params["w1"].shape[1]
    c = params["cw"].shape[1]
    c_pad = _round_up(c, LANE)
    bf16 = jnp.bfloat16

    # Node tile: >=256 (fills the 2x256x256 MXU on v6e/v7x), 512 for big N.
    node_tile = min(512, _round_up(max(n, 1), 256))
    n_pad = _round_up(n, node_tile)

    # Trace-time folding in f32 (A_hat == I): Linear2 + GCN1 + GCN2 -> one HxH
    # matmul; only the folded weights are cast to bf16, biases stay f32.
    wm = params["w2"] @ params["gw1"] @ params["gw2"]
    fb = (params["b2"] @ params["gw1"] + params["gb1"]) @ params["gw2"] + params["gb2"]
    bias = jnp.concatenate([params["b1"], fb], axis=0)                   # (2, H) f32
    w1_b = params["w1"].astype(bf16)
    wm_b = wm.astype(bf16)
    cw_b, cb_p = _pack_classifier(params["cw"], params["cb"], c_pad)

    # Pad + bf16 cast fuse into a single XLA pass (no extra f32 HBM copy);
    # padded rows are garbage-free (zeros) and sliced off below.
    x_b = jnp.pad(x, ((0, n_pad - n), (0, 0))).astype(bf16)

    h_pad, nlog_pad = pl.pallas_call(
        pythagoras_identity_kernel,
        out_shape=(
            jax.ShapeDtypeStruct((n_pad, h_dim), jnp.float32),
            jax.ShapeDtypeStruct((n_pad, c_pad), jnp.float32),
        ),
        grid_spec=pltpu.PrefetchScalarGridSpec(
            num_scalar_prefetch=0,
            grid=(n_pad // node_tile,),
            in_specs=[
                pl.BlockSpec((node_tile, f), lambda i: (i, 0)),      # x tile (streamed, bf16)
                pl.BlockSpec((f, h_dim), lambda i: (0, 0)),          # W1 (VMEM-resident)
                pl.BlockSpec((h_dim, h_dim), lambda i: (0, 0)),      # folded HxH weight
                pl.BlockSpec((2, h_dim), lambda i: (0, 0)),          # biases (f32)
                pl.BlockSpec((h_dim, c_pad), lambda i: (0, 0)),      # classifier weight
                pl.BlockSpec((1, c_pad), lambda i: (0, 0)),          # classifier bias (f32)
            ],
            out_specs=(
                pl.BlockSpec((node_tile, h_dim), lambda i: (i, 0)),  # h tile
                pl.BlockSpec((node_tile, c_pad), lambda i: (i, 0)),  # per-node logits tile
            ),
        ),
        compiler_params=pltpu.CompilerParams(
            # No cross-tile reduction anymore -> fully parallel node axis
            # (lets v7x shard tiles across its two TensorCores).
            dimension_semantics=("parallel",),
            vmem_limit_bytes=32 * 1024 * 1024,
        ),
    )(x_b, w1_b, wm_b, bias, cw_b, cb_p)
    return h_pad[:n], nlog_pad[:n, :c]


@jax.jit
def _pool_and_classify(pool, h, params):
    """Mean-pool + classifier in XLA (only used for multi-node edge-free graphs)."""
    hg = pool @ h
    return hg @ params["cw"] + params["cb"]


@jax.jit
def _forward_dense(x, adj, pool, params):
    n = x.shape[0]
    h_dim = params["w1"].shape[1]
    c = params["cw"].shape[1]
    g = pool.shape[0]
    c_pad = _round_up(c, LANE)
    bf16 = jnp.bfloat16

    m1 = params["w2"] @ params["gw1"]                               # fold Linear2 -> GCN1 (f32)
    fb1 = params["b2"] @ params["gw1"]
    gw = jnp.stack([m1, params["gw2"]], axis=0).astype(bf16)        # (2, H, H) bf16
    bias = jnp.concatenate(
        [params["b1"], fb1, params["gb1"], params["gb2"]], axis=0)  # (4, H) f32
    cw_b, cb_p = _pack_classifier(params["cw"], params["cb"], c_pad)

    vmem = pl.BlockSpec(memory_space=pltpu.MemorySpace.VMEM)
    logits_pad, h = pl.pallas_call(
        pythagoras_dense_kernel,
        out_shape=(
            jax.ShapeDtypeStruct((g, c_pad), jnp.float32),
            jax.ShapeDtypeStruct((n, h_dim), jnp.float32),
        ),
        in_specs=[vmem] * 8,
        out_specs=(vmem, vmem),
        compiler_params=pltpu.CompilerParams(vmem_limit_bytes=32 * 1024 * 1024),
    )(x.astype(bf16), adj.astype(bf16), pool.astype(bf16),
      params["w1"].astype(bf16), gw, bias, cw_b, cb_p)
    return logits_pad[:, :c], h


def build_normalized_adj(edge_index, num_nodes):
    """Dense GCN-normalized adjacency with self loops: D^-1/2 (A+I) D^-1/2."""
    a = np.zeros((num_nodes, num_nodes), dtype=np.float32)
    ei = np.asarray(edge_index)
    if ei.size > 0:
        src, dst = ei
        np.add.at(a, (dst, src), 1.0)
    a += np.eye(num_nodes, dtype=np.float32)
    deg = a.sum(axis=1)
    dinv = 1.0 / np.sqrt(np.maximum(deg, 1e-12))
    return jnp.asarray(dinv[:, None] * a * dinv[None, :])


def build_pool_matrix(batch, num_graphs):
    """[G, N] matrix whose rows average nodes belonging to each graph (vectorized)."""
    batch = np.asarray(batch)
    n = batch.shape[0]
    counts = np.bincount(batch, minlength=num_graphs).astype(np.float32)
    p = np.zeros((num_graphs, n), dtype=np.float32)
    p[batch, np.arange(n)] = 1.0 / np.maximum(counts[batch], 1.0)
    return jnp.asarray(p)


def pythagoras_forward(x, edge_index, batch, params, num_graphs):
    """Matches PythagorasModel.forward: returns (classifier(hg), h)."""
    n = int(x.shape[0])
    batch_np = np.asarray(batch)
    ei = None if edge_index is None else np.asarray(edge_index)

    if ei is None or ei.size == 0:
        # The module's pipeline always produces empty edge_index (single-node
        # graphs), so A_hat == I: take the specialized, adjacency-free path.
        h, node_logits = _forward_identity(x, params)
        if num_graphs == n and np.array_equal(batch_np, np.arange(n)):
            # One node per graph -> global_mean_pool is the identity; the
            # kernel's per-node classifier output already is the graph logits.
            return node_logits, h
        pool = build_pool_matrix(batch_np, num_graphs)
        return _pool_and_classify(pool, h, params), h

    if n > 2048:
        # TODO(synk): tile adj as (tile_n, tile_n) blocks with a reduction grid
        # axis; the module's real pipeline never reaches this fallback.
        raise NotImplementedError("dense-adjacency fallback is untiled; n > 2048 not supported")
    adj = build_normalized_adj(ei, n)
    pool = build_pool_matrix(batch_np, num_graphs)
    return _forward_dense(x, adj, pool, params)


def init_params(key, input_dim, hidden_dim, output_dim):
    ks = jax.random.split(key, 5)
    s = 0.05

    def w(k, shape):
        return (s * jax.random.normal(k, shape)).astype(jnp.float32)

    return {
        "w1": w(ks[0], (input_dim, hidden_dim)),
        "b1": jnp.full((1, hidden_dim), 0.03, jnp.float32),
        "w2": w(ks[1], (hidden_dim, hidden_dim)),
        "b2": jnp.full((1, hidden_dim), 0.01, jnp.float32),
        "gw1": w(ks[2], (hidden_dim, hidden_dim)),
        "gb1": jnp.full((1, hidden_dim), 0.02, jnp.float32),
        "gw2": w(ks[3], (hidden_dim, hidden_dim)),
        "gb2": jnp.full((1, hidden_dim), -0.01, jnp.float32),
        "cw": w(ks[4], (hidden_dim, output_dim)),
        "cb": jnp.full((1, output_dim), 0.005, jnp.float32),
    }


def reference_forward(x, adj, pool, params):
    """Un-folded plain-JAX f32 reference with the exact module semantics."""
    h = jnp.maximum(x @ params["w1"] + params["b1"], 0.0)
    h = h @ params["w2"] + params["b2"]
    h = adj @ (h @ params["gw1"]) + params["gb1"]
    h = adj @ (h @ params["gw2"]) + params["gb2"]
    hg = pool @ h
    return hg @ params["cw"] + params["cb"], h


if __name__ == "__main__":
    # Shapes consistent with the module's pipeline (scaled down): one node per
    # graph / column header, empty edge_index, SBERT-dim node features.
    INPUT_DIM = 384     # MiniLM embedding dim (additional features omitted here)
    HIDDEN_DIM = 128    # lane-aligned stand-in for the module's hidden_dim=768
    OUTPUT_DIM = 6
    NUM_GRAPHS = 256    # one column header per graph => one node per graph
    N_NODES = NUM_GRAPHS

    key = jax.random.PRNGKey(0)
    kx, kp = jax.random.split(key)

    x = jax.random.normal(kx, (N_NODES, INPUT_DIM), dtype=jnp.float32)
    x = x / jnp.linalg.norm(x, axis=1, keepdims=True)   # pipeline row-normalizes embeddings
    params = init_params(kp, INPUT_DIM, HIDDEN_DIM, OUTPUT_DIM)

    # bf16 MXU operands vs. pure-f32 reference -> relaxed (but bug-catching) tolerances.
    RTOL, ATOL = 3e-2, 3e-3

    # --- path 1: the real pipeline (empty edge_index -> identity adjacency, pool == I) ---
    edge_index = np.empty((2, 0), dtype=np.int64)
    batch = np.arange(NUM_GRAPHS, dtype=np.int64)       # node i belongs to graph i

    logits, h = pythagoras_forward(x, edge_index, batch, params, NUM_GRAPHS)
    jax.block_until_ready((logits, h))

    pool = build_pool_matrix(batch, NUM_GRAPHS)
    eye = jnp.eye(N_NODES, dtype=jnp.float32)
    ref_logits, ref_h = reference_forward(x, eye, pool, params)
    assert logits.shape == (NUM_GRAPHS, OUTPUT_DIM)
    assert h.shape == (N_NODES, HIDDEN_DIM)
    np.testing.assert_allclose(np.asarray(logits), np.asarray(ref_logits), rtol=RTOL, atol=ATOL)
    np.testing.assert_allclose(np.asarray(h), np.asarray(ref_h), rtol=RTOL, atol=ATOL)

    # --- path 2: identity adjacency, multi-node graphs (real mean-pool, done in XLA) ---
    g3 = 4
    batch3 = np.repeat(np.arange(g3, dtype=np.int64), N_NODES // g3)
    logits3, h3 = pythagoras_forward(x, edge_index, batch3, params, g3)
    jax.block_until_ready((logits3, h3))
    pool3 = build_pool_matrix(batch3, g3)
    ref_logits3, ref_h3 = reference_forward(x, eye, pool3, params)
    assert logits3.shape == (g3, OUTPUT_DIM)
    np.testing.assert_allclose(np.asarray(logits3), np.asarray(ref_logits3), rtol=RTOL, atol=ATOL)
    np.testing.assert_allclose(np.asarray(h3), np.asarray(ref_h3), rtol=RTOL, atol=ATOL)

    # --- path 3: general graphs with edges (dense normalized adjacency) ---
    n2, g2 = 16, 4
    x2 = jax.random.normal(jax.random.PRNGKey(1), (n2, INPUT_DIM), dtype=jnp.float32)
    x2 = x2 / jnp.linalg.norm(x2, axis=1, keepdims=True)
    edge_index2 = np.array([[0, 1, 2, 4, 5, 8, 9, 12],
                            [1, 2, 3, 5, 6, 9, 10, 13]], dtype=np.int64)
    batch2 = np.repeat(np.arange(g2), n2 // g2)

    logits2, h2 = pythagoras_forward(x2, edge_index2, batch2, params, g2)
    jax.block_until_ready((logits2, h2))

    adj2 = build_normalized_adj(edge_index2, n2)
    pool2 = build_pool_matrix(batch2, g2)
    ref_logits2, ref_h2 = reference_forward(x2, adj2, pool2, params)
    assert logits2.shape == (g2, OUTPUT_DIM)
    assert h2.shape == (n2, HIDDEN_DIM)
    np.testing.assert_allclose(np.asarray(logits2), np.asarray(ref_logits2), rtol=RTOL, atol=ATOL)
    np.testing.assert_allclose(np.asarray(h2), np.asarray(ref_h2), rtol=RTOL, atol=ATOL)

    print("KERNEL_OK")
</pallas_src>

<mosaic_0001>
module attributes {stable_mosaic.version = 11 : i64} {
  func.func @pythagoras_identity_kernel(%arg0: i32, %arg1: memref<256x384xbf16, #tpu.memory_space<vmem>>, %arg2: memref<384x128xbf16, #tpu.memory_space<vmem>>, %arg3: memref<128x128xbf16, #tpu.memory_space<vmem>>, %arg4: memref<2x128xf32, #tpu.memory_space<vmem>>, %arg5: memref<128x128xbf16, #tpu.memory_space<vmem>>, %arg6: memref<1x128xf32, #tpu.memory_space<vmem>>, %arg7: memref<256x128xf32, #tpu.memory_space<vmem>>, %arg8: memref<256x128xf32, #tpu.memory_space<vmem>>) attributes {dimension_semantics = [#tpu.dimension_semantics<parallel>], iteration_bounds = array<i64: 1>, scalar_prefetch = 0 : i64, scratch_operands = 0 : i64, tpu.core_type = #tpu.core_type<tc>, window_params = [{transform_indices = @transform_0, window_bounds = array<i64: 256, 384>}, {pipeline_mode = #tpu.pipeline_mode<synchronous>, transform_indices = @transform_1, window_bounds = array<i64: 384, 128>}, {pipeline_mode = #tpu.pipeline_mode<synchronous>, transform_indices = @transform_2, window_bounds = array<i64: 128, 128>}, {pipeline_mode = #tpu.pipeline_mode<synchronous>, transform_indices = @transform_3, window_bounds = array<i64: 2, 128>}, {pipeline_mode = #tpu.pipeline_mode<synchronous>, transform_indices = @transform_4, window_bounds = array<i64: 128, 128>}, {pipeline_mode = #tpu.pipeline_mode<synchronous>, transform_indices = @transform_5, window_bounds = array<i64: 1, 128>}, {transform_indices = @transform_6, window_bounds = array<i64: 256, 128>}, {transform_indices = @transform_7, window_bounds = array<i64: 256, 128>}]} {
    %c0 = arith.constant 0 : index
    %c0_0 = arith.constant 0 : index
    %0 = vector.load %arg4[%c0, %c0_0] : memref<2x128xf32, #tpu.memory_space<vmem>>, vector<2x128xf32>
    %c0_1 = arith.constant 0 : index
    %c0_2 = arith.constant 0 : index
    %1 = vector.load %arg1[%c0_1, %c0_2] : memref<256x384xbf16, #tpu.memory_space<vmem>>, vector<256x384xbf16>
    %c0_3 = arith.constant 0 : index
    %c0_4 = arith.constant 0 : index
    %2 = vector.load %arg2[%c0_3, %c0_4] : memref<384x128xbf16, #tpu.memory_space<vmem>>, vector<384x128xbf16>
    %cst = arith.constant dense<0.000000e+00> : vector<256x128xf32>
    %3 = tpu.matmul %1, %2, %cst {dimension_numbers = #tpu.dot_dimension_numbers<[1], [0], [0], [1], [0, 0, 1, 1], [], []>} : vector<256x384xbf16>, vector<384x128xbf16>, vector<256x128xf32> -> vector<256x128xf32>
    %4 = vector.extract_strided_slice %0 {offsets = [0, 0], sizes = [1, 128], strides = [1, 1]} : vector<2x128xf32> to vector<1x128xf32>
    %5 = vector.broadcast %4 : vector<1x128xf32> to vector<256x128xf32>
    %6 = arith.addf %3, %5 : vector<256x128xf32>
    %cst_5 = arith.constant 0.000000e+00 : f32
    %7 = vector.broadcast %cst_5 : f32 to vector<256x128xf32>
    %8 = arith.maximumf %6, %7 : vector<256x128xf32>
    %9 = arith.truncf %8 : vector<256x128xf32> to vector<256x128xbf16>
    %c0_6 = arith.constant 0 : index
    %c0_7 = arith.constant 0 : index
    %10 = vector.load %arg3[%c0_6, %c0_7] : memref<128x128xbf16, #tpu.memory_space<vmem>>, vector<128x128xbf16>
    %cst_8 = arith.constant dense<0.000000e+00> : vector<256x128xf32>
    %11 = tpu.matmul %9, %10, %cst_8 {dimension_numbers = #tpu.dot_dimension_numbers<[1], [0], [0], [1], [0, 0, 1, 1], [], []>} : vector<256x128xbf16>, vector<128x128xbf16>, vector<256x128xf32> -> vector<256x128xf32>
    %12 = vector.extract_strided_slice %0 {offsets = [1, 0], sizes = [1, 128], strides = [1, 1]} : vector<2x128xf32> to vector<1x128xf32>
    %13 = vector.broadcast %12 : vector<1x128xf32> to vector<256x128xf32>
    %14 = arith.addf %11, %13 : vector<256x128xf32>
    %c0_9 = arith.constant 0 : index
    %c0_10 = arith.constant 0 : index
    %15 = vector.load %arg7[%c0_9, %c0_10] : memref<256x128xf32, #tpu.memory_space<vmem>>, vector<256x128xf32>
    tpu.vector_store %arg7[%c0_9, %c0_10], %14 {strides = array<i32>} : memref<256x128xf32, #tpu.memory_space<vmem>>, vector<256x128xf32>,
    %16 = arith.truncf %14 : vector<256x128xf32> to vector<256x128xbf16>
    %c0_11 = arith.constant 0 : index
    %c0_12 = arith.constant 0 : index
    %17 = vector.load %arg5[%c0_11, %c0_12] : memref<128x128xbf16, #tpu.memory_space<vmem>>, vector<128x128xbf16>
    %cst_13 = arith.constant dense<0.000000e+00> : vector<256x128xf32>
    %18 = tpu.matmul %16, %17, %cst_13 {dimension_numbers = #tpu.dot_dimension_numbers<[1], [0], [0], [1], [0, 0, 1, 1], [], []>} : vector<256x128xbf16>, vector<128x128xbf16>, vector<256x128xf32> -> vector<256x128xf32>
    %c0_14 = arith.constant 0 : index
    %c0_15 = arith.constant 0 : index
    %19 = vector.load %arg6[%c0_14, %c0_15] : memref<1x128xf32, #tpu.memory_space<vmem>>, vector<1x128xf32>
    %20 = vector.broadcast %19 : vector<1x128xf32> to vector<256x128xf32>
    %21 = arith.addf %18, %20 : vector<256x128xf32>
    %c0_16 = arith.constant 0 : index
    %c0_17 = arith.constant 0 : index
    %22 = vector.load %arg8[%c0_16, %c0_17] : memref<256x128xf32, #tpu.memory_space<vmem>>, vector<256x128xf32>
    tpu.vector_store %arg8[%c0_16, %c0_17], %21 {strides = array<i32>} : memref<256x128xf32, #tpu.memory_space<vmem>>, vector<256x128xf32>,
    return
  }
  func.func @transform_0(%arg0: i32) -> (i32, i32) {
    %c0_i32 = arith.constant 0 : i32
    %c0_i32_0 = arith.constant 0 : i32
    return %arg0, %c0_i32 : i32, i32
  }
  func.func @transform_1(%arg0: i32) -> (i32, i32) {
    %c0_i32 = arith.constant 0 : i32
    %c0_i32_0 = arith.constant 0 : i32
    %c0_i32_1 = arith.constant 0 : i32
    return %c0_i32, %c0_i32_0 : i32, i32
  }
  func.func @transform_2(%arg0: i32) -> (i32, i32) {
    %c0_i32 = arith.constant 0 : i32
    %c0_i32_0 = arith.constant 0 : i32
    %c0_i32_1 = arith.constant 0 : i32
    return %c0_i32, %c0_i32_0 : i32, i32
  }
  func.func @transform_3(%arg0: i32) -> (i32, i32) {
    %c0_i32 = arith.constant 0 : i32
    %c0_i32_0 = arith.constant 0 : i32
    %c0_i32_1 = arith.constant 0 : i32
    return %c0_i32, %c0_i32_0 : i32, i32
  }
  func.func @transform_4(%arg0: i32) -> (i32, i32) {
    %c0_i32 = arith.constant 0 : i32
    %c0_i32_0 = arith.constant 0 : i32
    %c0_i32_1 = arith.constant 0 : i32
    return %c0_i32, %c0_i32_0 : i32, i32
  }
  func.func @transform_5(%arg0: i32) -> (i32, i32) {
    %c0_i32 = arith.constant 0 : i32
    %c0_i32_0 = arith.constant 0 : i32
    %c0_i32_1 = arith.constant 0 : i32
    return %c0_i32, %c0_i32_0 : i32, i32
  }
  func.func @transform_6(%arg0: i32) -> (i32, i32) {
    %c0_i32 = arith.constant 0 : i32
    %c0_i32_0 = arith.constant 0 : i32
    return %arg0, %c0_i32 : i32, i32
  }
  func.func @transform_7(%arg0: i32) -> (i32, i32) {
    %c0_i32 = arith.constant 0 : i32
    %c0_i32_0 = arith.constant 0 : i32
    return %arg0, %c0_i32 : i32, i32
  }
}

</mosaic_0001>

<bundles_post_ra>
// kernel: _forward_identity.1
= control target key start
LH: loop header
LB: loop body
LE: loop exit
PB: predicated region body
PF: predicated region fallthrough
CT: control target
= control target key end

     0   :  { %s2496_s0 = inlined_call_operand.vmem [shape: bf16[256,384], index: 0, kind: input, shape index: {}]   ;;  %s2497_s1 = inlined_call_operand.vmem [shape: bf16[384,128], index: 1, kind: input, shape index: {}]   ;;  %s2498_s2 = inlined_call_operand.vmem [shape: bf16[128,128], index: 2, kind: input, shape index: {}]   ;;  %s2499_s3 = inlined_call_operand.vmem [shape: f32[2,128], index: 3, kind: input, shape index: {}]   ;;  %s2500_s4 = inlined_call_operand.vmem [shape: bf16[128,128], index: 4, kind: input, shape index: {}]   ;;  %s2501_s5 = inlined_call_operand.vmem [shape: f32[1,128], index: 5, kind: input, shape index: {}]   ;;  %s2502_s6 = inlined_call_operand.hbm [shape: f32[256,128], index: 6, kind: output, shape index: {0}]   ;;  %s2503_s7 = inlined_call_operand.vmem [shape: f32[256,128], index: 7, kind: output, shape index: {1}]  }
   0x1   :  { %v1675_v0 = vld [vmem:[%s2497_s1 + $0x38] sm:$0xff]  ;;  %v1674_v1 = vld [vmem:[%s2497_s1 + $0x30] sm:$0xff]  ;;  %v1673_v2 = vld [vmem:[%s2497_s1 + $0x28] sm:$0xff] }
   0x2   :  { %1708 = vmatpush.bf16.msra.mxu1 %v1675_v0  ;;  %1709 = vmatpush.bf16.msra.mxu2 %v1675_v0 }
   0x3   :  { %540 = vmatpush.bf16.msra.mxu0 %v1675_v0  ;;  %1710 = vmatpush.bf16.msra.mxu3 %v1675_v0 }
   0x6   :  { %1711 = vmatpush.bf16.msra.mxu1 %v1674_v1  ;;  %1712 = vmatpush.bf16.msra.mxu2 %v1674_v1 }
   0x7   :  { %13 = vsyncpa [#allocation3], 0  ;;  %541 = vmatpush.bf16.msra.mxu0 %v1674_v1  ;;  %1713 = vmatpush.bf16.msra.mxu3 %v1674_v1  ;;  %v1672_v3 = vld [vmem:[%s2497_s1 + $0x20] sm:$0xff]  ;;  %v1671_v4 = vld [vmem:[%s2497_s1 + $0x18] sm:$0xff]  ;;  %s1252_s10 = sshll.u32 %s2502_s6, 4  ;;  %s1763_s13 = smov 128   ;;  %s1253_s10 = int_to_ptr.hbm [resolvable:$true] %s1252_s10 }
   0x8   :  { %v1670_v5 = vld [vmem:[%s2497_s1 + $0x10] sm:$0xff]  ;;  %v1669_v6 = vld [vmem:[%s2497_s1 + $0x8] sm:$0xff]  ;;  %v1668_v7 = vld [vmem:[%s2497_s1] sm:$0xff] }
   0x9   :  { %v1318_v8 = vld [vmem:[%s2496_s0 + $0x60] sm:$0xf]  ;;  %v1633_v9 = vld [vmem:[%s2496_s0 + $0x68] sm:$0xf0]  ;;  %v1691_v12 = vld [vmem:[%s2497_s1 + $0xb8] sm:$0xff] }
   0xa   :  { %1714 = vmatpush.bf16.msra.mxu1 %v1673_v2  ;;  %1715 = vmatpush.bf16.msra.mxu2 %v1673_v2  ;;  %v1366_v10 = vld [vmem:[%s2496_s0 + $0xc0] sm:$0xf]  ;;  %v1645_v11 = vld [vmem:[%s2496_s0 + $0xc8] sm:$0xf0]  ;;  %v1683_v13 = vld [vmem:[%s2497_s1 + $0x78] sm:$0xff]  ;;  %v1319_v14 = vor.u32 %v1633_v9, %v1318_v8 }
   0xb   :  { %542 = vmatpush.bf16.msra.mxu0 %v1673_v2  ;;  %1716 = vmatpush.bf16.msra.mxu3 %v1673_v2  ;;  %v1367_v15 = vor.u32 %v1645_v11, %v1366_v10  ;;  %v1690_v16 = vld [vmem:[%s2497_s1 + $0xb0] sm:$0xff]  ;;  %v1689_v18 = vld [vmem:[%s2497_s1 + $0xa8] sm:$0xff]  ;;  %v1688_v20 = vld [vmem:[%s2497_s1 + $0xa0] sm:$0xff] }
   0xc   :  { %v1682_v17 = vld [vmem:[%s2497_s1 + $0x70] sm:$0xff]  ;;  %v1681_v19 = vld [vmem:[%s2497_s1 + $0x68] sm:$0xff]  ;;  %v1680_v21 = vld [vmem:[%s2497_s1 + $0x60] sm:$0xff] }
   0xd   :  { %v1330_v22 = vld [vmem:[%s2496_s0 + $0x78] sm:$0xf]  ;;  %v1636_v23 = vld [vmem:[%s2496_s0 + $0x80] sm:$0xf0]  ;;  %v1686_v30 = vld [vmem:[%s2497_s1 + $0x90] sm:$0xff] }
   0xe   :  { %1717 = vmatpush.bf16.msra.mxu1 %v1672_v3  ;;  %1718 = vmatpush.bf16.msra.mxu2 %v1672_v3  ;;  %v1378_v24 = vld [vmem:[%s2496_s0 + $0xd8] sm:$0xf]  ;;  %v1648_v25 = vld [vmem:[%s2496_s0 + $0xe0] sm:$0xf0]  ;;  %v1331_v28 = vor.u32 %v1636_v23, %v1330_v22  ;;  %v1678_v31 = vld [vmem:[%s2497_s1 + $0x50] sm:$0xff] }
   0xf   :  { %543 = vmatpush.bf16.msra.mxu0 %v1672_v3  ;;  %1719 = vmatpush.bf16.msra.mxu3 %v1672_v3  ;;  %v1687_v26 = vld [vmem:[%s2497_s1 + $0x98] sm:$0xff]  ;;  %v1379_v29 = vor.u32 %v1648_v25, %v1378_v24  ;;  %v1270_v32 = vld [vmem:[%s2496_s0] sm:$0xf]  ;;  %v1621_v33 = vld [vmem:[%s2496_s0 + $0x8] sm:$0xf0] }
  0x10   :  { %v1679_v27 = vld [vmem:[%s2497_s1 + $0x58] sm:$0xff]  ;;  %v1685_v34 = vld [vmem:[%s2497_s1 + $0x88] sm:$0xff]  ;;  %v1271_v36 = vor.u32 %v1621_v33, %v1270_v32  ;;  %v1684_v37 = vld [vmem:[%s2497_s1 + $0x80] sm:$0xff] }
  0x11   :  { %v1677_v35 = vld [vmem:[%s2497_s1 + $0x48] sm:$0xff]  ;;  %v1676_v38 = vld [vmem:[%s2497_s1 + $0x40] sm:$0xff]  ;;  %v1342_v39 = vld [vmem:[%s2496_s0 + $0x90] sm:$0xf]  ;;  %s1762_s1 = smov [#allocation2]  }
  0x12   :  { %1720 = vmatpush.bf16.msra.mxu1 %v1671_v4  ;;  %1721 = vmatpush.bf16.msra.mxu2 %v1671_v4  ;;  %v1639_v40 = vld [vmem:[%s2496_s0 + $0x98] sm:$0xf0]  ;;  %v1390_v41 = vld [vmem:[%s2496_s0 + $0xf0] sm:$0xf]  ;;  %v1282_v45 = vld [vmem:[%s2496_s0 + $0x18] sm:$0xf] }
  0x13   :  { %544 = vmatpush.bf16.msra.mxu0 %v1671_v4  ;;  %1722 = vmatpush.bf16.msra.mxu3 %v1671_v4  ;;  %v1651_v42 = vld [vmem:[%s2496_s0 + $0xf8] sm:$0xf0]  ;;  %v1343_v43 = vor.u32 %v1639_v40, %v1342_v39  ;;  %v1624_v46 = vld [vmem:[%s2496_s0 + $0x20] sm:$0xf0]  ;;  %v1354_v48 = vld [vmem:[%s2496_s0 + $0xa8] sm:$0xf] }
  0x14   :  { %v1391_v44 = vor.u32 %v1651_v42, %v1390_v41  ;;  %v1283_v47 = vor.u32 %v1624_v46, %v1282_v45  ;;  %v1642_v49 = vld [vmem:[%s2496_s0 + $0xb0] sm:$0xf0]  ;;  %v1402_v50 = vld [vmem:[%s2496_s0 + $0x108] sm:$0xf]  ;;  %v1294_v54 = vld [vmem:[%s2496_s0 + $0x30] sm:$0xf] }
  0x15   :  { %v1654_v51 = vld [vmem:[%s2496_s0 + $0x110] sm:$0xf0]  ;;  %v1355_v52 = vor.u32 %v1642_v49, %v1354_v48  ;;  %v1627_v55 = vld [vmem:[%s2496_s0 + $0x38] sm:$0xf0]  ;;  %v1620_v57 = vld [vmem:[%s2496_s0 + $0x4] sm:$0xf] }
  0x16   :  { %1723 = vmatpush.bf16.msra.mxu1 %v1670_v5  ;;  %1724 = vmatpush.bf16.msra.mxu2 %v1670_v5  ;;  %v1403_v53 = vor.u32 %v1654_v51, %v1402_v50  ;;  %v1295_v56 = vor.u32 %v1627_v55, %v1294_v54  ;;  %v1272_v58 = vld [vmem:[%s2496_s0 + $0xc] sm:$0xf0]  ;;  %v1278_v59 = vld [vmem:[%s2496_s0 + $0x8] sm:$0xf]  ;;  %v1622_v60 = vld [vmem:[%s2496_s0 + $0x10] sm:$0xf0] }
  0x17   :  { %545 = vmatpush.bf16.msra.mxu0 %v1670_v5  ;;  %1725 = vmatpush.bf16.msra.mxu3 %v1670_v5  ;;  %v1275_v61 = vor.u32 %v1620_v57, %v1272_v58  ;;  %v1279_v62 = vor.u32 %v1622_v60, %v1278_v59  ;;  %v1306_v63 = vld [vmem:[%s2496_s0 + $0x48] sm:$0xf]  ;;  %v1630_v0 = vld [vmem:[%s2496_s0 + $0x50] sm:$0xf0]  ;;  %v1623_v2 = vld [vmem:[%s2496_s0 + $0x1c] sm:$0xf] }
  0x18   :  { %v1307_v1 = vor.u32 %v1630_v0, %v1306_v63  ;;  %v1284_v3 = vld [vmem:[%s2496_s0 + $0x24] sm:$0xf0]  ;;  %v1290_v4 = vld [vmem:[%s2496_s0 + $0x20] sm:$0xf]  ;;  %v1625_v5 = vld [vmem:[%s2496_s0 + $0x28] sm:$0xf0] }
  0x19   :  { %v1626_v8 = vld [vmem:[%s2496_s0 + $0x34] sm:$0xf]  ;;  %v1296_v9 = vld [vmem:[%s2496_s0 + $0x3c] sm:$0xf0]  ;;  %v1302_v10 = vld [vmem:[%s2496_s0 + $0x38] sm:$0xf] }
  0x1a   :  { %1726 = vmatpush.bf16.msra.mxu1 %v1669_v6  ;;  %1727 = vmatpush.bf16.msra.mxu2 %v1669_v6  ;;  %v1628_v11 = vld [vmem:[%s2496_s0 + $0x40] sm:$0xf0]  ;;  %v1699_v23 = vld [vmem:[%s2498_s2 + $0x38] sm:$0xff]  ;;  %v1637_v45 = vld [vmem:[%s2496_s0 + $0x88] sm:$0xf0] }
  0x1b   :  { %546 = vmatpush.bf16.msra.mxu0 %v1669_v6  ;;  %1728 = vmatpush.bf16.msra.mxu3 %v1669_v6  ;;  %v1287_v6 = vor.u32 %v1623_v2, %v1284_v3  ;;  %v1426_v24 = vld [vmem:[%s2496_s0 + $0x138] sm:$0xf]  ;;  %v1660_v25 = vld [vmem:[%s2496_s0 + $0x140] sm:$0xf0]  ;;  %v1663_v39 = vld [vmem:[%s2496_s0 + $0x158] sm:$0xf0] }
  0x1c   :  { %v1696_v40 = vld [vmem:[%s2498_s2 + $0x20] sm:$0xff]  ;;  %v1635_v42 = vld [vmem:[%s2496_s0 + $0x7c] sm:$0xf]  ;;  %v1666_v54 = vld [vmem:[%s2496_s0 + $0x170] sm:$0xf0] }
  0x1d   :  { %v1695_v50 = vld [vmem:[%s2498_s2 + $0x18] sm:$0xff]  ;;  %v1694_v55 = vld [vmem:[%s2498_s2 + $0x10] sm:$0xff]  ;;  %v1344_v58 = vld [vmem:[%s2496_s0 + $0x9c] sm:$0xf0] }
  0x1e   :  { %1729 = vmatpush.bf16.msra.mxu1 %v1668_v7  ;;  %1730 = vmatpush.bf16.msra.mxu2 %v1668_v7  ;;  %v1638_v57 = vld [vmem:[%s2496_s0 + $0x94] sm:$0xf]  ;;  %v1350_v59 = vld [vmem:[%s2496_s0 + $0x98] sm:$0xf]  ;;  %v1640_v60 = vld [vmem:[%s2496_s0 + $0xa0] sm:$0xf0] }
  0x1f   :  { %547 = vmatpush.bf16.msra.mxu0 %v1668_v7  ;;  %1731 = vmatpush.bf16.msra.mxu3 %v1668_v7  ;;  %v1291_v7 = vor.u32 %v1625_v5, %v1290_v4  ;;  %v1351_v63 = vor.u32 %v1640_v60, %v1350_v59  ;;  %v1692_v4 = vld [vmem:[%s2498_s2] sm:$0xff]  ;;  %v1641_v5 = vld [vmem:[%s2496_s0 + $0xac] sm:$0xf] }
  0x21   :  { %568 = vmatmul.bf16.vlgmr.msra.gmra.mxu1 %v1319_v14  ;;  %588 = vmatmul.bf16.vlgmr.msra.gmra.mxu2 %v1367_v15  ;;  %v1414_v14 = vld [vmem:[%s2496_s0 + $0x120] sm:$0xf]  ;;  %v1657_v15 = vld [vmem:[%s2496_s0 + $0x128] sm:$0xf0] }
  0x22   :  { %718 = vmatpush.bf16.msrb.mxu2 %v1691_v12  ;;  %629 = vmatpush.bf16.msrb.mxu1 %v1683_v13  ;;  %v1299_v12 = vor.u32 %v1626_v8, %v1296_v9  ;;  %v1303_v13 = vor.u32 %v1628_v11, %v1302_v10  ;;  %v1643_v8 = vld [vmem:[%s2496_s0 + $0xb8] sm:$0xf0] }
  0x23   :  { %548 = vmatmul.bf16.vlgmr.msra.gmra.mxu0 %v1271_v36  ;;  %920 = vmatpush.bf16.msrb.mxu3 %v1699_v23 }
  0x26   :  { %719 = vmatpush.bf16.msrb.mxu2 %v1690_v16  ;;  %630 = vmatpush.bf16.msrb.mxu1 %v1682_v17  ;;  %v1415_v16 = vor.u32 %v1657_v15, %v1414_v14  ;;  %v1629_v17 = vld [vmem:[%s2496_s0 + $0x4c] sm:$0xf] }
  0x28   :  { %608 = vmatmul.bf16.vlgmr.msra.gmra.mxu3 %v1415_v16  ;;  %v1644_v16 = vld [vmem:[%s2496_s0 + $0xc4] sm:$0xf] }
  0x2a   :  { %720 = vmatpush.bf16.msrb.mxu2 %v1689_v18  ;;  %631 = vmatpush.bf16.msrb.mxu1 %v1681_v19  ;;  %v1308_v18 = vld [vmem:[%s2496_s0 + $0x54] sm:$0xf0]  ;;  %v1314_v19 = vld [vmem:[%s2496_s0 + $0x50] sm:$0xf] }
  0x2e   :  { %721 = vmatpush.bf16.msrb.mxu2 %v1688_v20  ;;  %632 = vmatpush.bf16.msrb.mxu1 %v1680_v21  ;;  %v1631_v20 = vld [vmem:[%s2496_s0 + $0x58] sm:$0xf0]  ;;  %v1311_v21 = vor.u32 %v1629_v17, %v1308_v18  ;;  %v1368_v18 = vld [vmem:[%s2496_s0 + $0xcc] sm:$0xf0] }
  0x2f   :  { %v1315_v22 = vor.u32 %v1631_v20, %v1314_v19  ;;  %v1374_v19 = vld [vmem:[%s2496_s0 + $0xc8] sm:$0xf]  ;;  %v1646_v20 = vld [vmem:[%s2496_s0 + $0xd0] sm:$0xf0] }
  0x30   :  { %v1375_v23 = vor.u32 %v1646_v20, %v1374_v19 }
  0x31   :  { %573 = vmatmul.bf16.gmra.mxu1 %v1331_v28  ;;  %593 = vmatmul.bf16.gmra.mxu2 %v1379_v29  ;;  %v1632_v28 = vld [vmem:[%s2496_s0 + $0x64] sm:$0xf]  ;;  %v1320_v29 = vld [vmem:[%s2496_s0 + $0x6c] sm:$0xf0] }
  0x32   :  { %722 = vmatpush.bf16.msrb.mxu2 %v1687_v26  ;;  %633 = vmatpush.bf16.msrb.mxu1 %v1679_v27  ;;  %v1698_v26 = vld [vmem:[%s2498_s2 + $0x30] sm:$0xff]  ;;  %v1427_v27 = vor.u32 %v1660_v25, %v1426_v24  ;;  %v1323_v32 = vor.u32 %v1632_v28, %v1320_v29  ;;  %v2140_v24 = vld [vmem:[%s2499_s3] sm:$0x3]  ;;  %s1764_s3 = smov 8  }
  0x33   :  { %553 = vmatmul.bf16.gmra.mxu0 %v1283_v47  ;;  %921 = vmatpush.bf16.msrb.mxu3 %v1698_v26  ;;  %v2143_v26 = vperm.slane %v2140_v24, 0 }
  0x36   :  { %723 = vmatpush.bf16.msrb.mxu2 %v1686_v30  ;;  %634 = vmatpush.bf16.msrb.mxu1 %v1678_v31  ;;  %v1326_v30 = vld [vmem:[%s2496_s0 + $0x68] sm:$0xf]  ;;  %v1634_v31 = vld [vmem:[%s2496_s0 + $0x70] sm:$0xf0] }
  0x37   :  { %v1327_v33 = vor.u32 %v1634_v31, %v1326_v30 }
  0x38   :  { %613 = vmatmul.bf16.gmra.mxu3 %v1427_v27 }
  0x3a   :  { %724 = vmatpush.bf16.msrb.mxu2 %v1685_v34  ;;  %635 = vmatpush.bf16.msrb.mxu1 %v1677_v35  ;;  %v1697_v35 = vld [vmem:[%s2498_s2 + $0x28] sm:$0xff] }
  0x3b   :  { %922 = vmatpush.bf16.msrb.mxu3 %v1697_v35  ;;  %v1380_v35 = vld [vmem:[%s2496_s0 + $0xe4] sm:$0xf0] }
  0x3e   :  { %725 = vmatpush.bf16.msrb.mxu2 %v1684_v37  ;;  %636 = vmatpush.bf16.msrb.mxu1 %v1676_v38  ;;  %v1438_v38 = vld [vmem:[%s2496_s0 + $0x150] sm:$0xf] }
  0x3f   :  { %v1439_v41 = vor.u32 %v1663_v39, %v1438_v38  ;;  %923 = vmatpush.bf16.msrb.mxu3 %v1696_v40  ;;  %v1386_v38 = vld [vmem:[%s2496_s0 + $0xe0] sm:$0xf]  ;;  %v1649_v39 = vld [vmem:[%s2496_s0 + $0xe8] sm:$0xf0] }
  0x41   :  { %578 = vmatmul.bf16.gmra.mxu1 %v1343_v43  ;;  %598 = vmatmul.bf16.gmra.mxu2 %v1391_v44  ;;  %v1332_v43 = vld [vmem:[%s2496_s0 + $0x84] sm:$0xf0]  ;;  %v1338_v44 = vld [vmem:[%s2496_s0 + $0x80] sm:$0xf] }
  0x42   :  { %v1335_v47 = vor.u32 %v1635_v42, %v1332_v43  ;;  %v1339_v48 = vor.u32 %v1637_v45, %v1338_v44  ;;  %v1387_v45 = vor.u32 %v1649_v39, %v1386_v38 }
  0x43   :  { %558 = vmatmul.bf16.gmra.mxu0 %v1295_v56  ;;  %924 = vmatpush.bf16.msrb.mxu3 %v1695_v50 }
  0x47   :  { %925 = vmatpush.bf16.msrb.mxu3 %v1694_v55 }
  0x48   :  { %618 = vmatmul.bf16.gmra.mxu3 %v1439_v41 }
  0x51   :  { %583 = vmatmul.bf16.gmra.mxu1 %v1355_v52  ;;  %603 = vmatmul.bf16.gmra.mxu2 %v1403_v53  ;;  %v1450_v53 = vld [vmem:[%s2496_s0 + $0x168] sm:$0xf] }
  0x52   :  { %v1451_v56 = vor.u32 %v1666_v54, %v1450_v53 }
  0x53   :  { %563 = vmatmul.bf16.gmra.mxu0 %v1307_v1  ;;  %v1693_v1 = vld [vmem:[%s2498_s2 + $0x8] sm:$0xff] }
  0x54   :  { %926 = vmatpush.bf16.msrb.mxu3 %v1693_v1  ;;  %v1398_v1 = vld [vmem:[%s2496_s0 + $0xf8] sm:$0xf] }
  0x58   :  { %623 = vmatmul.bf16.gmra.mxu3 %v1451_v56 }
  0x59   :  { %927 = vmatpush.bf16.msrb.mxu3 %v1692_v4  ;;  %v1652_v4 = vld [vmem:[%s2496_s0 + $0x100] sm:$0xf0] }
  0x61   :  { %637 = vmatmul.bf16.vlgmr.msrb.gmra.mxu1 %v1275_v61  ;;  %726 = vmatmul.bf16.vlgmr.msrb.gmra.mxu2 %v1279_v62  ;;  %v1347_v62 = vor.u32 %v1638_v57, %v1344_v58 }
  0x71   :  { %642 = vmatmul.bf16.gmra.mxu1 %v1287_v6  ;;  %731 = vmatmul.bf16.gmra.mxu2 %v1291_v7  ;;  %v1356_v6 = vld [vmem:[%s2496_s0 + $0xb4] sm:$0xf0]  ;;  %v1362_v7 = vld [vmem:[%s2496_s0 + $0xb0] sm:$0xf] }
  0x72   :  { %v1359_v10 = vor.u32 %v1641_v5, %v1356_v6  ;;  %v1363_v11 = vor.u32 %v1643_v8, %v1362_v7 }
  0x81   :  { %647 = vmatmul.bf16.gmra.mxu1 %v1299_v12  ;;  %736 = vmatmul.bf16.gmra.mxu2 %v1303_v13 }
  0x91   :  { %652 = vmatmul.bf16.gmra.mxu1 %v1311_v21  ;;  %741 = vmatmul.bf16.gmra.mxu2 %v1315_v22  ;;  %v1371_v22 = vor.u32 %v1644_v16, %v1368_v18 }
  0x9e   :  { %v2027_v34 = vpop.f32.mrf.mxu1 }
  0xa0   :  { %v549_v13 = vpop.f32.mrf.mxu0 }
  0xa1   :  { %657 = vmatmul.bf16.gmra.mxu1 %v1323_v32  ;;  %746 = vmatmul.bf16.gmra.mxu2 %v1327_v33  ;;  %v550_v27 = vadd.f32 %v549_v13, %v2143_v26  ;;  %v1647_v33 = vld [vmem:[%s2496_s0 + $0xdc] sm:$0xf] }
  0xa2   :  { %v1383_v44 = vor.u32 %v1647_v33, %v1380_v35 }
  0xa4   :  { %v2032_v36 = vpop.f32.mrf.mxu2 }
  0xa6   :  { %v2034_v37 = vpop.f32.mrf.mxu1 }
  0xa8   :  { %v551_v17 = vpop.f32.mrf.mxu0 }
  0xa9   :  { %v552_v32 = vadd.f32 %v551_v17, %v2143_v26 }
  0xac   :  { %v2057_v46 = vpop.f32.mrf.mxu2 }
  0xae   :  { %v2059_v49 = vpop.f32.mrf.mxu1 }
  0xb0   :  { %v554_v29 = vpop.f32.mrf.mxu0 }
  0xb1   :  { %662 = vmatmul.bf16.gmra.mxu1 %v1335_v47  ;;  %751 = vmatmul.bf16.gmra.mxu2 %v1339_v48  ;;  %v555_v55 = vadd.f32 %v554_v29, %v2143_v26  ;;  %v1404_v29 = vld [vmem:[%s2496_s0 + $0x114] sm:$0xf0] }
  0xb4   :  { %v2064_v51 = vpop.f32.mrf.mxu2 }
  0xb6   :  { %v2066_v52 = vpop.f32.mrf.mxu1 }
  0xb8   :  { %v556_v48 = vpop.f32.mrf.mxu0 }
  0xb9   :  { %v557_v60 = vadd.f32 %v556_v48, %v2143_v26 }
  0xbc   :  { %v2089_v61 = vpop.f32.mrf.mxu2 }
  0xbe   :  { %v2091_v0 = vpop.f32.mrf.mxu1 }
  0xc0   :  { %v559_v59 = vpop.f32.mrf.mxu0 }
  0xc1   :  { %667 = vmatmul.bf16.gmra.mxu1 %v1347_v62  ;;  %756 = vmatmul.bf16.gmra.mxu2 %v1351_v63  ;;  %v1650_v62 = vld [vmem:[%s2496_s0 + $0xf4] sm:$0xf]  ;;  %v1392_v63 = vld [vmem:[%s2496_s0 + $0xfc] sm:$0xf0]  ;;  %v560_v20 = vadd.f32 %v559_v59, %v2143_v26 }
  0xc2   :  { %v1658_v59 = vld [vmem:[%s2496_s0 + $0x130] sm:$0xf0] }
  0xc4   :  { %v2096_v2 = vpop.f32.mrf.mxu2 }
  0xc6   :  { %v2098_v3 = vpop.f32.mrf.mxu1 }
  0xc8   :  { %v561_v19 = vpop.f32.mrf.mxu0 }
  0xcc   :  { %v2115_v9 = vpop.f32.mrf.mxu2 }
  0xce   :  { %v2117_v12 = vpop.f32.mrf.mxu1 }
  0xd0   :  { %v564_v35 = vpop.f32.mrf.mxu0 }
  0xd1   :  { %672 = vmatmul.bf16.gmra.mxu1 %v1359_v10  ;;  %761 = vmatmul.bf16.gmra.mxu2 %v1363_v11  ;;  %v1395_v10 = vor.u32 %v1650_v62, %v1392_v63  ;;  %v1399_v11 = vor.u32 %v1652_v4, %v1398_v1 }
  0xd4   :  { %v2119_v14 = vpop.f32.mrf.mxu2 }
  0xd6   :  { %v2121_v15 = vpop.f32.mrf.mxu1 }
  0xdc   :  { %v2135_v21 = vpop.f32.mrf.mxu2 }
  0xde   :  { %v638_v25 = vpop.f32.mrf.mxu1 }
  0xdf   :  { %v639_v31 = vadd.f32 %v638_v25, %v550_v27  ;;  %v562_v27 = vadd.f32 %v561_v19, %v2143_v26  ;;  %v2209_v19 = vpop.f32.mrf.mxu3 }
  0xe1   :  { %677 = vmatmul.bf16.gmra.mxu1 %v1371_v22  ;;  %766 = vmatmul.bf16.gmra.mxu2 %v1375_v23 }
  0xe4   :  { %v727_v28 = vpop.f32.mrf.mxu2 }
  0xe5   :  { %v728_v40 = vadd.f32 %v727_v28, %v639_v31  ;;  %v1653_v28 = vld [vmem:[%s2496_s0 + $0x10c] sm:$0xf]  ;;  %v1655_v31 = vld [vmem:[%s2496_s0 + $0x118] sm:$0xf0] }
  0xe6   :  { %v640_v30 = vpop.f32.mrf.mxu1 }
  0xe7   :  { %v641_v41 = vadd.f32 %v640_v30, %v552_v32  ;;  %v807_v50 = vmax.f32 %v728_v40, 0.0  ;;  %v1410_v30 = vld [vmem:[%s2496_s0 + $0x110] sm:$0xf]  ;;  %v1407_v40 = vor.u32 %v1653_v28, %v1404_v29 }
  0xec   :  { %v729_v42 = vpop.f32.mrf.mxu2 }
  0xed   :  { %v730_v43 = vadd.f32 %v729_v42, %v641_v41  ;;  %v1411_v41 = vor.u32 %v1655_v31, %v1410_v30 }
  0xee   :  { %v643_v47 = vpop.f32.mrf.mxu1 }
  0xef   :  { %v808_v53 = vmax.f32 %v730_v43, 0.0  ;;  %v644_v58 = vadd.f32 %v643_v47, %v555_v55  ;;  %v565_v47 = vadd.f32 %v564_v35, %v2143_v26 }
  0xf1   :  { %682 = vmatmul.bf16.gmra.mxu1 %v1383_v44  ;;  %771 = vmatmul.bf16.gmra.mxu2 %v1387_v45  ;;  %v839_v54 = vpack.c.bf16 %v808_v53, %v807_v50  ;;  %v566_v50 = vpop.f32.mrf.mxu0 }
  0xf2   :  { %v567_v55 = vadd.f32 %v566_v50, %v2143_v26  ;;  %v1662_v50 = vld [vmem:[%s2496_s0 + $0x154] sm:$0xf] }
  0xf3   :  { %928 = vmatmul.bf16.vlgmr.msrb.gmra.mxu3 %v839_v54 }
  0xf4   :  { %v732_v56 = vpop.f32.mrf.mxu2 }
  0xf5   :  { %v733_v5 = vadd.f32 %v732_v56, %v644_v58  ;;  %v1656_v56 = vld [vmem:[%s2496_s0 + $0x124] sm:$0xf]  ;;  %v1422_v58 = vld [vmem:[%s2496_s0 + $0x128] sm:$0xf] }
  0xf6   :  { %v645_v57 = vpop.f32.mrf.mxu1 }
  0xf7   :  { %v646_v6 = vadd.f32 %v645_v57, %v557_v60  ;;  %v809_v16 = vmax.f32 %v733_v5, 0.0  ;;  %v1416_v57 = vld [vmem:[%s2496_s0 + $0x12c] sm:$0xf0]  ;;  %v1423_v5 = vor.u32 %v1658_v59, %v1422_v58 }
  0xf8   :  { %v1419_v4 = vor.u32 %v1656_v56, %v1416_v57 }
  0xfc   :  { %v734_v7 = vpop.f32.mrf.mxu2 }
  0xfd   :  { %v735_v8 = vadd.f32 %v734_v7, %v646_v6 }
  0xfe   :  { %v648_v13 = vpop.f32.mrf.mxu1 }
  0xff   :  { %v810_v17 = vmax.f32 %v735_v8, 0.0  ;;  %v649_v25 = vadd.f32 %v648_v13, %v560_v20  ;;  %v572_v20 = vadd.f32 %v2034_v37, %v2143_v26 }
 0x101   :  { %687 = vmatmul.bf16.gmra.mxu1 %v1395_v10  ;;  %776 = vmatmul.bf16.gmra.mxu2 %v1399_v11  ;;  %v840_v18 = vpack.c.bf16 %v810_v17, %v809_v16  ;;  %v1707_v11 = vld [vmem:[%s2500_s4 + $0x38] sm:$0xff]  ;;  %v570_v17 = vadd.f32 %v2027_v34, %v2143_v26  ;;  %v1434_v34 = vld [vmem:[%s2496_s0 + $0x140] sm:$0xf] }
 0x102   :  { %1125 = vmatpush.bf16.msrb.mxu0 %v1707_v11  ;;  %v1702_v11 = vld [vmem:[%s2500_s4 + $0x10] sm:$0xff] }
 0x103   :  { %933 = vmatmul.bf16.gmra.mxu3 %v840_v18  ;;  %v1706_v18 = vld [vmem:[%s2500_s4 + $0x30] sm:$0xff] }
 0x104   :  { %v737_v22 = vpop.f32.mrf.mxu2 }
 0x105   :  { %v738_v32 = vadd.f32 %v737_v22, %v649_v25  ;;  %v1428_v25 = vld [vmem:[%s2496_s0 + $0x144] sm:$0xf0] }
 0x106   :  { %v650_v23 = vpop.f32.mrf.mxu1  ;;  %1126 = vmatpush.bf16.msrb.mxu0 %v1706_v18  ;;  %v1452_v18 = vld [vmem:[%s2496_s0 + $0x174] sm:$0xf0] }
 0x107   :  { %v651_v33 = vadd.f32 %v650_v23, %v562_v27  ;;  %v811_v43 = vmax.f32 %v738_v32, 0.0  ;;  %v1659_v23 = vld [vmem:[%s2496_s0 + $0x13c] sm:$0xf]  ;;  %v1661_v27 = vld [vmem:[%s2496_s0 + $0x148] sm:$0xf0] }
 0x108   :  { %v1431_v31 = vor.u32 %v1659_v23, %v1428_v25  ;;  %v1435_v32 = vor.u32 %v1661_v27, %v1434_v34 }
 0x10c   :  { %v739_v38 = vpop.f32.mrf.mxu2 }
 0x10d   :  { %v740_v39 = vadd.f32 %v739_v38, %v651_v33 }
 0x10e   :  { %v653_v42 = vpop.f32.mrf.mxu1 }
 0x10f   :  { %v812_v44 = vmax.f32 %v740_v39, 0.0  ;;  %v654_v54 = vadd.f32 %v653_v42, %v565_v47  ;;  %v577_v47 = vadd.f32 %v2066_v52, %v2143_v26 }
 0x111   :  { %692 = vmatmul.bf16.gmra.mxu1 %v1407_v40  ;;  %781 = vmatmul.bf16.gmra.mxu2 %v1411_v41  ;;  %v841_v45 = vpack.c.bf16 %v812_v44, %v811_v43  ;;  %v2225_v40 = vpop.f32.mrf.mxu3  ;;  %v1705_v41 = vld [vmem:[%s2500_s4 + $0x28] sm:$0xff]  ;;  %v575_v44 = vadd.f32 %v2059_v49, %v2143_v26  ;;  %v1446_v49 = vld [vmem:[%s2496_s0 + $0x158] sm:$0xf] }
 0x112   :  { %1127 = vmatpush.bf16.msrb.mxu0 %v1705_v41 }
 0x113   :  { %938 = vmatmul.bf16.gmra.mxu3 %v841_v45  ;;  %v1704_v45 = vld [vmem:[%s2500_s4 + $0x20] sm:$0xff] }
 0x114   :  { %v742_v48 = vpop.f32.mrf.mxu2 }
 0x115   :  { %v743_v60 = vadd.f32 %v742_v48, %v654_v54  ;;  %v1664_v54 = vld [vmem:[%s2496_s0 + $0x160] sm:$0xf0] }
 0x116   :  { %v655_v53 = vpop.f32.mrf.mxu1  ;;  %1128 = vmatpush.bf16.msrb.mxu0 %v1704_v45 }
 0x117   :  { %v656_v62 = vadd.f32 %v655_v53, %v567_v55  ;;  %v813_v7 = vmax.f32 %v743_v60, 0.0  ;;  %v1440_v53 = vld [vmem:[%s2496_s0 + $0x15c] sm:$0xf0]  ;;  %v1447_v60 = vor.u32 %v1664_v54, %v1446_v49 }
 0x118   :  { %v1443_v59 = vor.u32 %v1662_v50, %v1440_v53 }
 0x119   :  { %v2249_v57 = vpop.f32.mrf.mxu3 }
 0x11c   :  { %v744_v63 = vpop.f32.mrf.mxu2 }
 0x11d   :  { %v745_v1 = vadd.f32 %v744_v63, %v656_v62 }
 0x11e   :  { %v658_v6 = vpop.f32.mrf.mxu1 }
 0x11f   :  { %v814_v8 = vmax.f32 %v745_v1, 0.0  ;;  %v659_v22 = vadd.f32 %v658_v6, %v570_v17  ;;  %v1665_v17 = vld [vmem:[%s2496_s0 + $0x16c] sm:$0xf] }
 0x120   :  { %v1455_v34 = vor.u32 %v1665_v17, %v1452_v18  ;;  %v597_v17 = vadd.f32 %v2089_v61, %v2143_v26 }
 0x121   :  { %697 = vmatmul.bf16.gmra.mxu1 %v1419_v4  ;;  %786 = vmatmul.bf16.gmra.mxu2 %v1423_v5  ;;  %v842_v10 = vpack.c.bf16 %v814_v8, %v813_v7  ;;  %v1703_v5 = vld [vmem:[%s2500_s4 + $0x18] sm:$0xff]  ;;  %v2254_v7 = vpop.f32.mrf.mxu3 }
 0x122   :  { %1129 = vmatpush.bf16.msrb.mxu0 %v1703_v5 }
 0x123   :  { %943 = vmatmul.bf16.gmra.mxu3 %v842_v10  ;;  %v580_v10 = vadd.f32 %v2091_v0, %v2143_v26  ;;  %v1458_v0 = vld [vmem:[%s2496_s0 + $0x170] sm:$0xf] }
 0x124   :  { %v747_v13 = vpop.f32.mrf.mxu2 }
 0x125   :  { %v748_v28 = vadd.f32 %v747_v13, %v659_v22  ;;  %v582_v13 = vadd.f32 %v2098_v3, %v2143_v26 }
 0x126   :  { %v660_v16 = vpop.f32.mrf.mxu1  ;;  %1130 = vmatpush.bf16.msrb.mxu0 %v1702_v11 }
 0x127   :  { %v661_v37 = vadd.f32 %v660_v16, %v572_v20  ;;  %v815_v35 = vmax.f32 %v748_v28, 0.0  ;;  %v1667_v20 = vld [vmem:[%s2496_s0 + $0x178] sm:$0xf0] }
 0x128   :  { %v1459_v27 = vor.u32 %v1667_v20, %v1458_v0 }
 0x12c   :  { %v749_v29 = vpop.f32.mrf.mxu2 }
 0x12d   :  { %v750_v30 = vadd.f32 %v749_v29, %v661_v37 }
 0x12e   :  { %v663_v33 = vpop.f32.mrf.mxu1 }
 0x12f   :  { %v816_v38 = vmax.f32 %v750_v30, 0.0  ;;  %v664_v48 = vadd.f32 %v663_v33, %v575_v44  ;;  %v2275_v30 = vpop.f32.mrf.mxu3 }
 0x131   :  { %702 = vmatmul.bf16.gmra.mxu1 %v1431_v31  ;;  %791 = vmatmul.bf16.gmra.mxu2 %v1435_v32  ;;  %v843_v39 = vpack.c.bf16 %v816_v38, %v815_v35  ;;  %v1701_v32 = vld [vmem:[%s2500_s4 + $0x8] sm:$0xff]  ;;  %v585_v38 = vadd.f32 %v2117_v12, %v2143_v26 }
 0x132   :  { %1131 = vmatpush.bf16.msrb.mxu0 %v1701_v32 }
 0x133   :  { %948 = vmatmul.bf16.gmra.mxu3 %v843_v39  ;;  %v587_v39 = vadd.f32 %v2121_v15, %v2143_v26 }
 0x134   :  { %v752_v42 = vpop.f32.mrf.mxu2 }
 0x135   :  { %v753_v55 = vadd.f32 %v752_v42, %v664_v48  ;;  %v1700_v42 = vld [vmem:[%s2500_s4] sm:$0xff] }
 0x136   :  { %v665_v43 = vpop.f32.mrf.mxu1  ;;  %1132 = vmatpush.bf16.msrb.mxu0 %v1700_v42 }
 0x137   :  { %v666_v52 = vadd.f32 %v665_v43, %v577_v47  ;;  %v817_v63 = vmax.f32 %v753_v55, 0.0  ;;  %v2287_v43 = vpop.f32.mrf.mxu3 }
 0x13c   :  { %v754_v56 = vpop.f32.mrf.mxu2 }
 0x13d   :  { %v755_v58 = vadd.f32 %v754_v56, %v666_v52  ;;  %v590_v52 = vadd.f32 %v2032_v36, %v2143_v26  ;;  %v592_v56 = vadd.f32 %v2057_v46, %v2143_v26  ;;  %v595_v46 = vadd.f32 %v2064_v51, %v2143_v26 }
 0x13e   :  { %v668_v62 = vpop.f32.mrf.mxu1 }
 0x13f   :  { %v818_v1 = vmax.f32 %v755_v58, 0.0  ;;  %v669_v16 = vadd.f32 %v668_v62, %v580_v10  ;;  %v2289_v12 = vpop.f32.mrf.mxu3  ;;  %v2298_v10 = vperm.slane %v2140_v24, 1 }
 0x141   :  { %707 = vmatmul.bf16.gmra.mxu1 %v1443_v59  ;;  %796 = vmatmul.bf16.gmra.mxu2 %v1447_v60  ;;  %v844_v4 = vpack.c.bf16 %v818_v1, %v817_v63 }
 0x143   :  { %953 = vmatmul.bf16.gmra.mxu3 %v844_v4 }
 0x144   :  { %v757_v6 = vpop.f32.mrf.mxu2 }
 0x145   :  { %v758_v22 = vadd.f32 %v757_v6, %v669_v16 }
 0x146   :  { %v670_v8 = vpop.f32.mrf.mxu1 }
 0x147   :  { %v671_v3 = vadd.f32 %v670_v8, %v582_v13  ;;  %v819_v37 = vmax.f32 %v758_v22, 0.0  ;;  %v2295_v1 = vpop.f32.mrf.mxu3 }
 0x14c   :  { %v759_v23 = vpop.f32.mrf.mxu2 }
 0x14d   :  { %v760_v25 = vadd.f32 %v759_v23, %v671_v3 }
 0x14e   :  { %v673_v28 = vpop.f32.mrf.mxu1 }
 0x14f   :  { %v820_v29 = vmax.f32 %v760_v25, 0.0  ;;  %v674_v41 = vadd.f32 %v673_v28, %v585_v38 }
 0x151   :  { %712 = vmatmul.bf16.gmra.mxu1 %v1455_v34  ;;  %801 = vmatmul.bf16.gmra.mxu2 %v1459_v27  ;;  %v845_v31 = vpack.c.bf16 %v820_v29, %v819_v37 }
 0x153   :  { %958 = vmatmul.bf16.gmra.mxu3 %v845_v31  ;;  %v600_v31 = vadd.f32 %v2096_v2, %v2143_v26 }
 0x154   :  { %v762_v33 = vpop.f32.mrf.mxu2 }
 0x155   :  { %v763_v44 = vadd.f32 %v762_v33, %v674_v41  ;;  %v602_v33 = vadd.f32 %v2115_v9, %v2143_v26 }
 0x156   :  { %v675_v35 = vpop.f32.mrf.mxu1 }
 0x157   :  { %v676_v45 = vadd.f32 %v675_v35, %v587_v39  ;;  %v821_v53 = vmax.f32 %v763_v44, 0.0 }
 0x15c   :  { %v764_v47 = vpop.f32.mrf.mxu2 }
 0x15d   :  { %v765_v48 = vadd.f32 %v764_v47, %v676_v45 }
 0x15e   :  { %v678_v50 = vpop.f32.mrf.mxu1 }
 0x15f   :  { %v822_v49 = vmax.f32 %v765_v48, 0.0  ;;  %v679_v58 = vadd.f32 %v678_v50, %v590_v52  ;;  %v607_v52 = vadd.f32 %v2135_v21, %v2143_v26 }
 0x161   :  { %v846_v54 = vpack.c.bf16 %v822_v49, %v821_v53 }
 0x163   :  { %963 = vmatmul.bf16.gmra.mxu3 %v846_v54 }
 0x164   :  { %v767_v15 = vpop.f32.mrf.mxu2 }
 0x165   :  { %v768_v59 = vadd.f32 %v767_v15, %v679_v58  ;;  %v605_v15 = vadd.f32 %v2119_v14, %v2143_v26 }
 0x166   :  { %v680_v55 = vpop.f32.mrf.mxu1 }
 0x167   :  { %v681_v60 = vadd.f32 %v680_v55, %v592_v56  ;;  %v823_v5 = vmax.f32 %v768_v59, 0.0 }
 0x16c   :  { %v769_v62 = vpop.f32.mrf.mxu2 }
 0x16d   :  { %v770_v63 = vadd.f32 %v769_v62, %v681_v60 }
 0x16e   :  { %v683_v4 = vpop.f32.mrf.mxu1 }
 0x16f   :  { %v824_v6 = vmax.f32 %v770_v63, 0.0  ;;  %v684_v18 = vadd.f32 %v683_v4, %v595_v46  ;;  %v610_v46 = vadd.f32 %v2209_v19, %v2143_v26 }
 0x171   :  { %v847_v8 = vpack.c.bf16 %v824_v6, %v823_v5 }
 0x173   :  { %968 = vmatmul.bf16.gmra.mxu3 %v847_v8 }
 0x174   :  { %v772_v11 = vpop.f32.mrf.mxu2 }
 0x175   :  { %v773_v0 = vadd.f32 %v772_v11, %v684_v18 }
 0x176   :  { %v685_v36 = vpop.f32.mrf.mxu1  ;;  %v929_v13 = vpop.f32.mrf.mxu3 }
 0x177   :  { %v930_v16 = vadd.f32 %v929_v13, %v2298_v10  ;;  %v686_v20 = vadd.f32 %v685_v36, %v597_v17  ;;  %v825_v25 = vmax.f32 %v773_v0, 0.0  ;;  %v612_v17 = vadd.f32 %v2225_v40, %v2143_v26 }
 0x179   :  { %1009 = vst [vmem:[#allocation2] sm:$0xff] %v930_v16 }
 0x17c   :  { %v774_v22 = vpop.f32.mrf.mxu2 }
 0x17d   :  { %v775_v3 = vadd.f32 %v774_v22, %v686_v20 }
 0x17e   :  { %v688_v23 = vpop.f32.mrf.mxu1  ;;  %v931_v24 = vpop.f32.mrf.mxu3 }
 0x17f   :  { %v826_v34 = vmax.f32 %v775_v3, 0.0  ;;  %v932_v27 = vadd.f32 %v931_v24, %v2298_v10  ;;  %v689_v35 = vadd.f32 %v688_v23, %v600_v31  ;;  %v617_v31 = vadd.f32 %v2254_v7, %v2143_v26 }
 0x181   :  { %v848_v28 = vpack.c.bf16 %v826_v34, %v825_v25  ;;  %1010 = vst [vmem:[#allocation2 + $0x8] sm:$0xff] %v932_v27  ;;  %v1041_v51 = vpack.c.bf16 %v932_v27, %v930_v16 }
 0x183   :  { %973 = vmatmul.bf16.gmra.mxu3 %v848_v28  ;;  %1133 = vmatmul.bf16.vlgmr.msrb.gmra.mxu0 %v1041_v51 }
 0x184   :  { %v777_v37 = vpop.f32.mrf.mxu2 }
 0x185   :  { %v778_v38 = vadd.f32 %v777_v37, %v689_v35 }
 0x186   :  { %v690_v29 = vpop.f32.mrf.mxu1  ;;  %v934_v61 = vpop.f32.mrf.mxu3 }
 0x187   :  { %v935_v32 = vadd.f32 %v934_v61, %v2298_v10  ;;  %v691_v39 = vadd.f32 %v690_v29, %v602_v33  ;;  %v827_v47 = vmax.f32 %v778_v38, 0.0  ;;  %v615_v29 = vadd.f32 %v2249_v57, %v2143_v26 }
 0x189   :  { %1011 = vst [vmem:[#allocation2 + $0x10] sm:$0xff] %v935_v32 }
 0x18c   :  { %v779_v41 = vpop.f32.mrf.mxu2 }
 0x18d   :  { %v780_v42 = vadd.f32 %v779_v41, %v691_v39 }
 0x18e   :  { %v693_v44 = vpop.f32.mrf.mxu1  ;;  %v936_v45 = vpop.f32.mrf.mxu3 }
 0x18f   :  { %v828_v48 = vmax.f32 %v780_v42, 0.0  ;;  %v937_v50 = vadd.f32 %v936_v45, %v2298_v10  ;;  %v694_v56 = vadd.f32 %v693_v44, %v605_v15 }
 0x191   :  { %v849_v53 = vpack.c.bf16 %v828_v48, %v827_v47  ;;  %1012 = vst [vmem:[#allocation2 + $0x18] sm:$0xff] %v937_v50  ;;  %v1042_v2 = vpack.c.bf16 %v937_v50, %v935_v32 }
 0x193   :  { %978 = vmatmul.bf16.gmra.mxu3 %v849_v53  ;;  %1138 = vmatmul.bf16.gmra.mxu0 %v1042_v2  ;;  %v620_v2 = vadd.f32 %v2275_v30, %v2143_v26 }
 0x194   :  { %v782_v49 = vpop.f32.mrf.mxu2 }
 0x195   :  { %v783_v58 = vadd.f32 %v782_v49, %v694_v56 }
 0x196   :  { %v695_v54 = vpop.f32.mrf.mxu1  ;;  %v939_v9 = vpop.f32.mrf.mxu3 }
 0x197   :  { %v940_v55 = vadd.f32 %v939_v9, %v2298_v10  ;;  %v696_v59 = vadd.f32 %v695_v54, %v607_v52  ;;  %v829_v5 = vmax.f32 %v783_v58, 0.0  ;;  %v622_v54 = vadd.f32 %v2287_v43, %v2143_v26 }
 0x198   :  { %v625_v43 = vadd.f32 %v2289_v12, %v2143_v26 }
 0x199   :  { %1013 = vst [vmem:[#allocation2 + $0x20] sm:$0xff] %v940_v55 }
 0x19c   :  { %v784_v60 = vpop.f32.mrf.mxu2 }
 0x19d   :  { %v785_v62 = vadd.f32 %v784_v60, %v696_v59 }
 0x19e   :  { %v698_v63 = vpop.f32.mrf.mxu1  ;;  %v941_v4 = vpop.f32.mrf.mxu3 }
 0x19f   :  { %v830_v6 = vmax.f32 %v785_v62, 0.0  ;;  %v942_v8 = vadd.f32 %v941_v4, %v2298_v10  ;;  %v699_v18 = vadd.f32 %v698_v63, %v610_v46 }
 0x1a1   :  { %v850_v11 = vpack.c.bf16 %v830_v6, %v829_v5  ;;  %1014 = vst [vmem:[#allocation2 + $0x28] sm:$0xff] %v942_v8  ;;  %v1043_v14 = vpack.c.bf16 %v942_v8, %v940_v55 }
 0x1a3   :  { %983 = vmatmul.bf16.gmra.mxu3 %v850_v11  ;;  %1143 = vmatmul.bf16.gmra.mxu0 %v1043_v14  ;;  %v627_v14 = vadd.f32 %v2295_v1, %v2143_v26 }
 0x1a4   :  { %v787_v36 = vpop.f32.mrf.mxu2 }
 0x1a5   :  { %v788_v0 = vadd.f32 %v787_v36, %v699_v18 }
 0x1a6   :  { %v700_v13 = vpop.f32.mrf.mxu1  ;;  %v944_v21 = vpop.f32.mrf.mxu3 }
 0x1a7   :  { %v945_v16 = vadd.f32 %v944_v21, %v2298_v10  ;;  %v701_v20 = vadd.f32 %v700_v13, %v612_v17  ;;  %v831_v25 = vmax.f32 %v788_v0, 0.0 }
 0x1a9   :  { %1015 = vst [vmem:[#allocation2 + $0x30] sm:$0xff] %v945_v16 }
 0x1ac   :  { %v789_v22 = vpop.f32.mrf.mxu2 }
 0x1ad   :  { %v790_v3 = vadd.f32 %v789_v22, %v701_v20 }
 0x1ae   :  { %v703_v23 = vpop.f32.mrf.mxu1  ;;  %v946_v24 = vpop.f32.mrf.mxu3 }
 0x1af   :  { %v832_v34 = vmax.f32 %v790_v3, 0.0  ;;  %v947_v27 = vadd.f32 %v946_v24, %v2298_v10  ;;  %v704_v32 = vadd.f32 %v703_v23, %v615_v29 }
 0x1b1   :  { %v851_v28 = vpack.c.bf16 %v832_v34, %v831_v25  ;;  %1016 = vst [vmem:[#allocation2 + $0x38] sm:$0xff] %v947_v27  ;;  %v1044_v19 = vpack.c.bf16 %v947_v27, %v945_v16  ;;  %v2348_v27 = vld [vmem:[%s2501_s5] ss:$0 sm:$0xff]  ;;  %s1250_s5 = sshll.u32 %s1762_s1, 4  ;;  %s1251_s5 = int_to_ptr.vmem [resolvable:$true] %s1250_s5 }
 0x1b3   :  { %988 = vmatmul.bf16.gmra.mxu3 %v851_v28  ;;  %1148 = vmatmul.bf16.gmra.mxu0 %v1044_v19 }
 0x1b4   :  { %v792_v51 = vpop.f32.mrf.mxu2 }
 0x1b5   :  { %v793_v33 = vadd.f32 %v792_v51, %v704_v32 }
 0x1b6   :  { %v705_v37 = vpop.f32.mrf.mxu1  ;;  %v949_v40 = vpop.f32.mrf.mxu3 }
 0x1b7   :  { %v950_v61 = vadd.f32 %v949_v40, %v2298_v10  ;;  %v706_v35 = vadd.f32 %v705_v37, %v617_v31  ;;  %v833_v44 = vmax.f32 %v793_v33, 0.0 }
 0x1b9   :  { %1017 = vst [vmem:[#allocation2 + $0x40] sm:$0xff] %v950_v61 }
 0x1bc   :  { %v794_v38 = vpop.f32.mrf.mxu2 }
 0x1bd   :  { %v795_v39 = vadd.f32 %v794_v38, %v706_v35 }
 0x1be   :  { %v708_v41 = vpop.f32.mrf.mxu1  ;;  %v951_v42 = vpop.f32.mrf.mxu3 }
 0x1bf   :  { %v834_v45 = vmax.f32 %v795_v39, 0.0  ;;  %v952_v47 = vadd.f32 %v951_v42, %v2298_v10  ;;  %v709_v9 = vadd.f32 %v708_v41, %v620_v2 }
 0x1c1   :  { %v852_v48 = vpack.c.bf16 %v834_v45, %v833_v44  ;;  %1018 = vst [vmem:[#allocation2 + $0x48] sm:$0xff] %v952_v47  ;;  %v1045_v57 = vpack.c.bf16 %v952_v47, %v950_v61 }
 0x1c3   :  { %993 = vmatmul.bf16.gmra.mxu3 %v852_v48  ;;  %1153 = vmatmul.bf16.gmra.mxu0 %v1045_v57 }
 0x1c4   :  { %v797_v50 = vpop.f32.mrf.mxu2 }
 0x1c5   :  { %v798_v15 = vadd.f32 %v797_v50, %v709_v9 }
 0x1c6   :  { %v710_v53 = vpop.f32.mrf.mxu1  ;;  %v954_v7 = vpop.f32.mrf.mxu3 }
 0x1c7   :  { %v955_v49 = vadd.f32 %v954_v7, %v2298_v10  ;;  %v711_v55 = vadd.f32 %v710_v53, %v622_v54  ;;  %v835_v60 = vmax.f32 %v798_v15, 0.0 }
 0x1c9   :  { %1019 = vst [vmem:[#allocation2 + $0x50] sm:$0xff] %v955_v49 }
 0x1cc   :  { %v799_v52 = vpop.f32.mrf.mxu2 }
 0x1cd   :  { %v800_v56 = vadd.f32 %v799_v52, %v711_v55 }
 0x1ce   :  { %v713_v58 = vpop.f32.mrf.mxu1  ;;  %v956_v59 = vpop.f32.mrf.mxu3 }
 0x1cf   :  { %v836_v62 = vmax.f32 %v800_v56, 0.0  ;;  %v957_v63 = vadd.f32 %v956_v59, %v2298_v10  ;;  %v714_v36 = vadd.f32 %v713_v58, %v625_v43 }
 0x1d1   :  { %v853_v4 = vpack.c.bf16 %v836_v62, %v835_v60  ;;  %1020 = vst [vmem:[#allocation2 + $0x58] sm:$0xff] %v957_v63  ;;  %v1046_v30 = vpack.c.bf16 %v957_v63, %v955_v49 }
 0x1d3   :  { %998 = vmatmul.bf16.gmra.mxu3 %v853_v4  ;;  %1158 = vmatmul.bf16.gmra.mxu0 %v1046_v30 }
 0x1d4   :  { %v802_v5 = vpop.f32.mrf.mxu2 }
 0x1d5   :  { %v803_v13 = vadd.f32 %v802_v5, %v714_v36 }
 0x1d6   :  { %v959_v6 = vpop.f32.mrf.mxu3  ;;  %v715_v11 = vpop.f32.mrf.mxu1 }
 0x1d7   :  { %v960_v8 = vadd.f32 %v959_v6, %v2298_v10  ;;  %v716_v21 = vadd.f32 %v715_v11, %v627_v14  ;;  %v837_v18 = vmax.f32 %v803_v13, 0.0 }
 0x1d9   :  { %1021 = vst [vmem:[#allocation2 + $0x60] sm:$0xff] %v960_v8 }
 0x1dc   :  { %v804_v46 = vpop.f32.mrf.mxu2 }
 0x1dd   :  { %v805_v16 = vadd.f32 %v804_v46, %v716_v21 }
 0x1de   :  { %v961_v17 = vpop.f32.mrf.mxu3 }
 0x1df   :  { %v838_v0 = vmax.f32 %v805_v16, 0.0  ;;  %v962_v20 = vadd.f32 %v961_v17, %v2298_v10 }
 0x1e1   :  { %v854_v22 = vpack.c.bf16 %v838_v0, %v837_v18  ;;  %1022 = vst [vmem:[#allocation2 + $0x68] sm:$0xff] %v962_v20  ;;  %v1047_v12 = vpack.c.bf16 %v962_v20, %v960_v8 }
 0x1e3   :  { %1003 = vmatmul.bf16.gmra.mxu3 %v854_v22  ;;  %1163 = vmatmul.bf16.gmra.mxu0 %v1047_v12 }
 0x1e6   :  { %v964_v3 = vpop.f32.mrf.mxu3 }
 0x1e7   :  { %v965_v23 = vadd.f32 %v964_v3, %v2298_v10 }
 0x1e9   :  { %1023 = vst [vmem:[#allocation2 + $0x70] sm:$0xff] %v965_v23 }
 0x1ee   :  { %v966_v26 = vpop.f32.mrf.mxu3 }
 0x1ef   :  { %v967_v1 = vadd.f32 %v966_v26, %v2298_v10 }
 0x1f1   :  { %1024 = vst [vmem:[#allocation2 + $0x78] sm:$0xff] %v967_v1  ;;  %v1048_v24 = vpack.c.bf16 %v967_v1, %v965_v23 }
 0x1f3   :  { %1168 = vmatmul.bf16.gmra.mxu0 %v1048_v24 }
 0x1f6   :  { %v969_v25 = vpop.f32.mrf.mxu3 }
 0x1f7   :  { %v970_v34 = vadd.f32 %v969_v25, %v2298_v10 }
 0x1f9   :  { %1025 = vst [vmem:[#allocation2 + $0x80] sm:$0xff] %v970_v34 }
 0x1fe   :  { %v971_v28 = vpop.f32.mrf.mxu3 }
 0x1ff   :  { %v972_v19 = vadd.f32 %v971_v28, %v2298_v10 }
 0x200   :  { %v1134_v51 = vpop.f32.mrf.mxu0 }
 0x201   :  { %1026 = vst [vmem:[#allocation2 + $0x88] sm:$0xff] %v972_v19  ;;  %v1049_v37 = vpack.c.bf16 %v972_v19, %v970_v34  ;;  %v1135_v40 = vadd.f32 %v2348_v27, %v1134_v51 }
 0x203   :  { %1214 = vst [vmem:[%s2503_s7] sm:$0xff] %v1135_v40  ;;  %1173 = vmatmul.bf16.gmra.mxu0 %v1049_v37 }
 0x206   :  { %v974_v29 = vpop.f32.mrf.mxu3 }
 0x207   :  { %v975_v61 = vadd.f32 %v974_v29, %v2298_v10 }
 0x208   :  { %v1136_v31 = vpop.f32.mrf.mxu0 }
 0x209   :  { %1027 = vst [vmem:[#allocation2 + $0x90] sm:$0xff] %v975_v61  ;;  %v1137_v32 = vadd.f32 %v2348_v27, %v1136_v31 }
 0x20b   :  { %1215 = vst [vmem:[%s2503_s7 + $0x8] sm:$0xff] %v1137_v32 }
 0x20e   :  { %v976_v33 = vpop.f32.mrf.mxu3 }
 0x20f   :  { %v977_v35 = vadd.f32 %v976_v33, %v2298_v10 }
 0x210   :  { %v1139_v38 = vpop.f32.mrf.mxu0 }
 0x211   :  { %1028 = vst [vmem:[#allocation2 + $0x98] sm:$0xff] %v977_v35  ;;  %v1050_v39 = vpack.c.bf16 %v977_v35, %v975_v61  ;;  %v1140_v41 = vadd.f32 %v2348_v27, %v1139_v38 }
 0x213   :  { %1216 = vst [vmem:[%s2503_s7 + $0x10] sm:$0xff] %v1140_v41  ;;  %1178 = vmatmul.bf16.gmra.mxu0 %v1050_v39 }
 0x216   :  { %v979_v42 = vpop.f32.mrf.mxu3 }
 0x217   :  { %v980_v44 = vadd.f32 %v979_v42, %v2298_v10 }
 0x218   :  { %v1141_v45 = vpop.f32.mrf.mxu0 }
 0x219   :  { %1029 = vst [vmem:[#allocation2 + $0xa0] sm:$0xff] %v980_v44  ;;  %v1142_v47 = vadd.f32 %v2348_v27, %v1141_v45 }
 0x21b   :  { %1217 = vst [vmem:[%s2503_s7 + $0x18] sm:$0xff] %v1142_v47 }
 0x21e   :  { %v981_v48 = vpop.f32.mrf.mxu3 }
 0x21f   :  { %v982_v57 = vadd.f32 %v981_v48, %v2298_v10 }
 0x220   :  { %v1144_v50 = vpop.f32.mrf.mxu0 }
 0x221   :  { %1030 = vst [vmem:[#allocation2 + $0xa8] sm:$0xff] %v982_v57  ;;  %v1051_v53 = vpack.c.bf16 %v982_v57, %v980_v44  ;;  %v1145_v7 = vadd.f32 %v2348_v27, %v1144_v50 }
 0x223   :  { %1218 = vst [vmem:[%s2503_s7 + $0x20] sm:$0xff] %v1145_v7  ;;  %1183 = vmatmul.bf16.gmra.mxu0 %v1051_v53 }
 0x226   :  { %v984_v2 = vpop.f32.mrf.mxu3 }
 0x227   :  { %v985_v49 = vadd.f32 %v984_v2, %v2298_v10 }
 0x228   :  { %v1146_v54 = vpop.f32.mrf.mxu0 }
 0x229   :  { %1031 = vst [vmem:[#allocation2 + $0xb0] sm:$0xff] %v985_v49  ;;  %v1147_v9 = vadd.f32 %v2348_v27, %v1146_v54 }
 0x22b   :  { %1219 = vst [vmem:[%s2503_s7 + $0x28] sm:$0xff] %v1147_v9 }
 0x22e   :  { %v986_v15 = vpop.f32.mrf.mxu3 }
 0x22f   :  { %v987_v55 = vadd.f32 %v986_v15, %v2298_v10 }
 0x230   :  { %v1149_v52 = vpop.f32.mrf.mxu0 }
 0x231   :  { %1032 = vst [vmem:[#allocation2 + $0xb8] sm:$0xff] %v987_v55  ;;  %v1052_v56 = vpack.c.bf16 %v987_v55, %v985_v49  ;;  %v1150_v58 = vadd.f32 %v2348_v27, %v1149_v52 }
 0x233   :  { %1220 = vst [vmem:[%s2503_s7 + $0x30] sm:$0xff] %v1150_v58  ;;  %1188 = vmatmul.bf16.gmra.mxu0 %v1052_v56 }
 0x236   :  { %v989_v59 = vpop.f32.mrf.mxu3 }
 0x237   :  { %v990_v60 = vadd.f32 %v989_v59, %v2298_v10 }
 0x238   :  { %v1151_v62 = vpop.f32.mrf.mxu0 }
 0x239   :  { %1033 = vst [vmem:[#allocation2 + $0xc0] sm:$0xff] %v990_v60  ;;  %v1152_v63 = vadd.f32 %v2348_v27, %v1151_v62 }
 0x23b   :  { %1221 = vst [vmem:[%s2503_s7 + $0x38] sm:$0xff] %v1152_v63 }
 0x23e   :  { %v991_v4 = vpop.f32.mrf.mxu3 }
 0x23f   :  { %v992_v30 = vadd.f32 %v991_v4, %v2298_v10 }
 0x240   :  { %v1154_v5 = vpop.f32.mrf.mxu0 }
 0x241   :  { %1034 = vst [vmem:[#allocation2 + $0xc8] sm:$0xff] %v992_v30  ;;  %v1053_v6 = vpack.c.bf16 %v992_v30, %v990_v60  ;;  %v1155_v43 = vadd.f32 %v2348_v27, %v1154_v5 }
 0x243   :  { %1222 = vst [vmem:[%s2503_s7 + $0x40] sm:$0xff] %v1155_v43  ;;  %1193 = vmatmul.bf16.gmra.mxu0 %v1053_v6 }
 0x246   :  { %v994_v8 = vpop.f32.mrf.mxu3 }
 0x247   :  { %v995_v11 = vadd.f32 %v994_v8, %v2298_v10 }
 0x248   :  { %v1156_v14 = vpop.f32.mrf.mxu0 }
 0x249   :  { %1035 = vst [vmem:[#allocation2 + $0xd0] sm:$0xff] %v995_v11  ;;  %v1157_v36 = vadd.f32 %v2348_v27, %v1156_v14 }
 0x24b   :  { %1223 = vst [vmem:[%s2503_s7 + $0x48] sm:$0xff] %v1157_v36 }
 0x24e   :  { %v996_v13 = vpop.f32.mrf.mxu3 }
 0x24f   :  { %v997_v21 = vadd.f32 %v996_v13, %v2298_v10 }
 0x250   :  { %v1159_v46 = vpop.f32.mrf.mxu0 }
 0x251   :  { %1036 = vst [vmem:[#allocation2 + $0xd8] sm:$0xff] %v997_v21  ;;  %v1054_v16 = vpack.c.bf16 %v997_v21, %v995_v11  ;;  %v1160_v17 = vadd.f32 %v2348_v27, %v1159_v46 }
 0x253   :  { %1224 = vst [vmem:[%s2503_s7 + $0x50] sm:$0xff] %v1160_v17  ;;  %1198 = vmatmul.bf16.gmra.mxu0 %v1054_v16 }
 0x256   :  { %v999_v18 = vpop.f32.mrf.mxu3 }
 0x257   :  { %v1000_v0 = vadd.f32 %v999_v18, %v2298_v10 }
 0x258   :  { %v1161_v20 = vpop.f32.mrf.mxu0 }
 0x259   :  { %1037 = vst [vmem:[#allocation2 + $0xe0] sm:$0xff] %v1000_v0  ;;  %v1162_v22 = vadd.f32 %v2348_v27, %v1161_v20 }
 0x25b   :  { %1225 = vst [vmem:[%s2503_s7 + $0x58] sm:$0xff] %v1162_v22 }
 0x25e   :  { %v1001_v12 = vpop.f32.mrf.mxu3 }
 0x25f   :  { %v1002_v3 = vadd.f32 %v1001_v12, %v2298_v10 }
 0x260   :  { %v1164_v23 = vpop.f32.mrf.mxu0 }
 0x261   :  { %1038 = vst [vmem:[#allocation2 + $0xe8] sm:$0xff] %v1002_v3  ;;  %v1055_v26 = vpack.c.bf16 %v1002_v3, %v1000_v0  ;;  %v1165_v1 = vadd.f32 %v2348_v27, %v1164_v23 }
 0x263   :  { %1226 = vst [vmem:[%s2503_s7 + $0x60] sm:$0xff] %v1165_v1  ;;  %1203 = vmatmul.bf16.gmra.mxu0 %v1055_v26 }
 0x266   :  { %v1004_v24 = vpop.f32.mrf.mxu3 }
 0x267   :  { %v1005_v25 = vadd.f32 %v1004_v24, %v2298_v10 }
 0x268   :  { %v1166_v34 = vpop.f32.mrf.mxu0 }
 0x269   :  { %1039 = vst [vmem:[#allocation2 + $0xf0] sm:$0xff] %v1005_v25  ;;  %v1167_v28 = vadd.f32 %v2348_v27, %v1166_v34 }
 0x26b   :  { %1227 = vst [vmem:[%s2503_s7 + $0x68] sm:$0xff] %v1167_v28 }
 0x26e   :  { %v1006_v19 = vpop.f32.mrf.mxu3 }
 0x26f   :  { %v1007_v51 = vadd.f32 %v1006_v19, %v2298_v10 }
 0x270   :  { %v1169_v37 = vpop.f32.mrf.mxu0 }
 0x271   :  { %1040 = vst [vmem:[#allocation2 + $0xf8] sm:$0xff] %v1007_v51  ;;  %v1056_v40 = vpack.c.bf16 %v1007_v51, %v1005_v25  ;;  %v1170_v29 = vadd.f32 %v2348_v27, %v1169_v37 }
 0x272   :  { %1258 = dma.vmem_to_hbm [thread:$0]  %s1251_s5, 4096, %s1253_s10, [#allocation3], %s1763_s13, %s1763_s13, %s1764_s3  }
 0x273   :  { %1228 = vst [vmem:[%s2503_s7 + $0x70] sm:$0xff] %v1170_v29  ;;  %1208 = vmatmul.bf16.gmra.mxu0 %v1056_v40 }
 0x278   :  { %v1171_v61 = vpop.f32.mrf.mxu0 }
 0x279   :  { %v1172_v31 = vadd.f32 %v2348_v27, %v1171_v61 }
 0x27b   :  { %1229 = vst [vmem:[%s2503_s7 + $0x78] sm:$0xff] %v1172_v31 }
 0x280   :  { %v1174_v10 = vpop.f32.mrf.mxu0 }
 0x281   :  { %v1175_v32 = vadd.f32 %v2348_v27, %v1174_v10 }
 0x283   :  { %1230 = vst [vmem:[%s2503_s7 + $0x80] sm:$0xff] %v1175_v32 }
 0x288   :  { %v1176_v33 = vpop.f32.mrf.mxu0 }
 0x289   :  { %v1177_v35 = vadd.f32 %v2348_v27, %v1176_v33 }
 0x28b   :  { %1231 = vst [vmem:[%s2503_s7 + $0x88] sm:$0xff] %v1177_v35 }
 0x290   :  { %v1179_v38 = vpop.f32.mrf.mxu0 }
 0x291   :  { %v1180_v39 = vadd.f32 %v2348_v27, %v1179_v38 }
 0x293   :  { %1232 = vst [vmem:[%s2503_s7 + $0x90] sm:$0xff] %v1180_v39 }
 0x298   :  { %v1181_v41 = vpop.f32.mrf.mxu0 }
 0x299   :  { %v1182_v42 = vadd.f32 %v2348_v27, %v1181_v41 }
 0x29b   :  { %1233 = vst [vmem:[%s2503_s7 + $0x98] sm:$0xff] %v1182_v42 }
 0x2a0   :  { %v1184_v44 = vpop.f32.mrf.mxu0 }
 0x2a1   :  { %v1185_v45 = vadd.f32 %v2348_v27, %v1184_v44 }
 0x2a3   :  { %1234 = vst [vmem:[%s2503_s7 + $0xa0] sm:$0xff] %v1185_v45 }
 0x2a8   :  { %v1186_v47 = vpop.f32.mrf.mxu0 }
 0x2a9   :  { %v1187_v48 = vadd.f32 %v2348_v27, %v1186_v47 }
 0x2ab   :  { %1235 = vst [vmem:[%s2503_s7 + $0xa8] sm:$0xff] %v1187_v48 }
 0x2b0   :  { %v1189_v57 = vpop.f32.mrf.mxu0 }
 0x2b1   :  { %v1190_v50 = vadd.f32 %v2348_v27, %v1189_v57 }
 0x2b3   :  { %1236 = vst [vmem:[%s2503_s7 + $0xb0] sm:$0xff] %v1190_v50 }
 0x2b8   :  { %v1191_v53 = vpop.f32.mrf.mxu0 }
 0x2b9   :  { %v1192_v7 = vadd.f32 %v2348_v27, %v1191_v53 }
 0x2bb   :  { %1237 = vst [vmem:[%s2503_s7 + $0xb8] sm:$0xff] %v1192_v7 }
 0x2c0   :  { %v1194_v2 = vpop.f32.mrf.mxu0 }
 0x2c1   :  { %v1195_v49 = vadd.f32 %v2348_v27, %v1194_v2 }
 0x2c3   :  { %1238 = vst [vmem:[%s2503_s7 + $0xc0] sm:$0xff] %v1195_v49 }
 0x2c8   :  { %v1196_v54 = vpop.f32.mrf.mxu0 }
 0x2c9   :  { %v1197_v9 = vadd.f32 %v2348_v27, %v1196_v54 }
 0x2cb   :  { %1239 = vst [vmem:[%s2503_s7 + $0xc8] sm:$0xff] %v1197_v9 }
 0x2d0   :  { %v1199_v15 = vpop.f32.mrf.mxu0 }
 0x2d1   :  { %v1200_v55 = vadd.f32 %v2348_v27, %v1199_v15 }
 0x2d3   :  { %1240 = vst [vmem:[%s2503_s7 + $0xd0] sm:$0xff] %v1200_v55 }
 0x2d8   :  { %v1201_v52 = vpop.f32.mrf.mxu0 }
 0x2d9   :  { %v1202_v56 = vadd.f32 %v2348_v27, %v1201_v52 }
 0x2db   :  { %1241 = vst [vmem:[%s2503_s7 + $0xd8] sm:$0xff] %v1202_v56 }
 0x2e0   :  { %v1204_v58 = vpop.f32.mrf.mxu0 }
 0x2e1   :  { %v1205_v59 = vadd.f32 %v2348_v27, %v1204_v58 }
 0x2e3   :  { %1242 = vst [vmem:[%s2503_s7 + $0xe0] sm:$0xff] %v1205_v59 }
 0x2e8   :  { %v1206_v60 = vpop.f32.mrf.mxu0 }
 0x2e9   :  { %v1207_v62 = vadd.f32 %v2348_v27, %v1206_v60 }
 0x2eb   :  { %1243 = vst [vmem:[%s2503_s7 + $0xe8] sm:$0xff] %v1207_v62 }
 0x2f0   :  { %v1209_v63 = vpop.f32.mrf.mxu0 }
 0x2f1   :  { %v1210_v4 = vadd.f32 %v2348_v27, %v1209_v63 }
 0x2f3   :  { %1244 = vst [vmem:[%s2503_s7 + $0xf0] sm:$0xff] %v1210_v4 }
 0x2f8   :  { %v1211_v30 = vpop.f32.mrf.mxu0 }
 0x2f9   :  { %v1212_v5 = vadd.f32 %v2348_v27, %v1211_v30 }
 0x2fb   :  { %1245 = vst [vmem:[%s2503_s7 + $0xf8] sm:$0xff] %v1212_v5 }
 0x2fc   :  { %1760 = dma.done.wait [#allocation3], 4096  }
 0x2fd   :  { %1761 = vsyncadd [#allocation3], 4294963200 }
 0x2fe   :  { %1267 = vsyncpa [#allocation3], 1 }

</bundles_post_ra>
